<compile_context>
chip_gen: v6e
topology: v6e:2x2x1
jax: 0.10.0
libtpu: 0.0.40
codegen_flags: <defaults>
</compile_context>

<pallas_src>
import jax
import jax.numpy as jnp
from jax.experimental import pallas as pl
from jax.experimental.pallas import tpu as pltpu

NEG_SLOPE = 0.01  # F.leaky_relu default negative_slope
DIMS = [(128, 256), (256, 512), (512, 512), (512, 768)]
IN_DIM = DIMS[0][0]
OUT_DIM = DIMS[-1][1]


def _leaky_relu(v):
    return jnp.where(v > 0, v, NEG_SLOPE * v)


def shared_decoder_kernel(x_ref,
                          w1_ref, b1_ref,
                          w2_ref, b2_ref,
                          w3_ref, b3_ref,
                          w4_ref, b4_ref,
                          o_ref):
    # x tile: [TB, 128] bf16.  Weights: bf16 [in, out].  Biases: f32 [1, out].
    layers = ((w1_ref, b1_ref), (w2_ref, b2_ref), (w3_ref, b3_ref), (w4_ref, b4_ref))
    h = x_ref[...]
    acc = None
    for idx, (w_ref, b_ref) in enumerate(layers):
        acc = jnp.dot(h, w_ref[...], preferred_element_type=jnp.float32)
        acc = acc + b_ref[...]          # f32 bias add (VPU, free filler)
        acc = _leaky_relu(acc)          # f32 leaky_relu (VPU select)
        if idx < len(layers) - 1:
            h = acc.astype(jnp.bfloat16)  # bf16 feed for the next MXU matmul
    o_ref[...] = acc.astype(o_ref.dtype)


def _round_up(x, m):
    return ((x + m - 1) // m) * m


def shared_decoder(x, params, block_b=256):
    """x: [B, 128] (any float dtype). params: w1..w4 bf16 [in,out], b1..b4 f32 [1,out].

    Returns f32 [B, 768].
    """
    B = x.shape[0]

    # Batch tile: cap at block_b, sublane-align to 8; pad the batch to a multiple.
    tb = min(block_b, _round_up(B, 8))
    padded_b = _round_up(B, tb)

    x_bf16 = x.astype(jnp.bfloat16)
    if padded_b != B:
        x_bf16 = jnp.pad(x_bf16, ((0, padded_b - B), (0, 0)))

    grid = (padded_b // tb,)

    batch_map = lambda i: (i, 0)   # x / out tiles follow the grid step
    const_map = lambda i: (0, 0)   # weights & biases stay resident across steps

    in_specs = [pl.BlockSpec((tb, IN_DIM), batch_map)]
    for (fi, fo) in DIMS:
        in_specs.append(pl.BlockSpec((fi, fo), const_map))  # weight (full array)
        in_specs.append(pl.BlockSpec((1, fo), const_map))   # bias (full array)

    out = pl.pallas_call(
        shared_decoder_kernel,
        out_shape=jax.ShapeDtypeStruct((padded_b, OUT_DIM), jnp.float32),
        grid=grid,
        in_specs=in_specs,
        out_specs=pl.BlockSpec((tb, OUT_DIM), batch_map),
        compiler_params=pltpu.CompilerParams(
            dimension_semantics=("parallel",)),  # shard batch over v7x's 2 TCs
    )(x_bf16,
      params["w1"], params["b1"],
      params["w2"], params["b2"],
      params["w3"], params["b3"],
      params["w4"], params["b4"])

    return out[:B]


def init_params(key):
    """PyTorch nn.Linear-style init (uniform +-1/sqrt(fan_in)).

    Weights are cast to bf16 ONCE here (not per call); biases stay f32.
    """
    params = {}
    keys = jax.random.split(key, 2 * len(DIMS))
    for i, (fan_in, fan_out) in enumerate(DIMS):
        bound = 1.0 / (fan_in ** 0.5)
        w = jax.random.uniform(keys[2 * i], (fan_in, fan_out),
                               minval=-bound, maxval=bound, dtype=jnp.float32)
        b = jax.random.uniform(keys[2 * i + 1], (1, fan_out),
                               minval=-bound, maxval=bound, dtype=jnp.float32)
        params[f"w{i + 1}"] = w.astype(jnp.bfloat16)
        params[f"b{i + 1}"] = b
    return params


def _reference(x, params):
    """Mirrors the kernel's bf16-weight / f32-accumulate arithmetic in plain JAX."""
    h = x.astype(jnp.bfloat16)
    out = None
    for i in range(1, 5):
        w = params[f"w{i}"].astype(jnp.float32)
        out = h.astype(jnp.float32) @ w + params[f"b{i}"]
        out = jnp.where(out > 0, out, NEG_SLOPE * out)
        h = out.astype(jnp.bfloat16)
    return out


if __name__ == "__main__":
    key = jax.random.PRNGKey(0)
    k_params, k_x = jax.random.split(key)

    params = init_params(k_params)
    B = 8  # small demo batch (sublane-aligned); tb collapses to 8, grid=(1,)
    x = jax.random.normal(k_x, (B, IN_DIM), dtype=jnp.float32)

    out = shared_decoder(x, params)
    out = jax.block_until_ready(out)

    ref = _reference(x, params)
    assert out.shape == (B, OUT_DIM), out.shape
    # bf16 weights/activations with f32 accumulation => loosened tolerance.
    assert jnp.allclose(out, ref, atol=2e-2, rtol=2e-2), "mismatch vs JAX reference"

    print("KERNEL_OK")
</pallas_src>

<mosaic_0001>
module attributes {stable_mosaic.version = 11 : i64} {
  func.func @shared_decoder_kernel(%arg0: i32, %arg1: memref<8x128xbf16, #tpu.memory_space<vmem>>, %arg2: memref<128x256xbf16, #tpu.memory_space<vmem>>, %arg3: memref<1x256xf32, #tpu.memory_space<vmem>>, %arg4: memref<256x512xbf16, #tpu.memory_space<vmem>>, %arg5: memref<1x512xf32, #tpu.memory_space<vmem>>, %arg6: memref<512x512xbf16, #tpu.memory_space<vmem>>, %arg7: memref<1x512xf32, #tpu.memory_space<vmem>>, %arg8: memref<512x768xbf16, #tpu.memory_space<vmem>>, %arg9: memref<1x768xf32, #tpu.memory_space<vmem>>, %arg10: memref<8x768xf32, #tpu.memory_space<vmem>>) attributes {dimension_semantics = [#tpu.dimension_semantics<parallel>], iteration_bounds = array<i64: 1>, scalar_prefetch = 0 : i64, scratch_operands = 0 : i64, tpu.core_type = #tpu.core_type<tc>, window_params = [{transform_indices = @transform_0, window_bounds = array<i64: 8, 128>}, {pipeline_mode = #tpu.pipeline_mode<synchronous>, transform_indices = @transform_1, window_bounds = array<i64: 128, 256>}, {pipeline_mode = #tpu.pipeline_mode<synchronous>, transform_indices = @transform_2, window_bounds = array<i64: 1, 256>}, {pipeline_mode = #tpu.pipeline_mode<synchronous>, transform_indices = @transform_3, window_bounds = array<i64: 256, 512>}, {pipeline_mode = #tpu.pipeline_mode<synchronous>, transform_indices = @transform_4, window_bounds = array<i64: 1, 512>}, {pipeline_mode = #tpu.pipeline_mode<synchronous>, transform_indices = @transform_5, window_bounds = array<i64: 512, 512>}, {pipeline_mode = #tpu.pipeline_mode<synchronous>, transform_indices = @transform_6, window_bounds = array<i64: 1, 512>}, {pipeline_mode = #tpu.pipeline_mode<synchronous>, transform_indices = @transform_7, window_bounds = array<i64: 512, 768>}, {pipeline_mode = #tpu.pipeline_mode<synchronous>, transform_indices = @transform_8, window_bounds = array<i64: 1, 768>}, {transform_indices = @transform_9, window_bounds = array<i64: 8, 768>}]} {
    %c0 = arith.constant 0 : index
    %c0_0 = arith.constant 0 : index
    %0 = vector.load %arg1[%c0, %c0_0] : memref<8x128xbf16, #tpu.memory_space<vmem>>, vector<8x128xbf16>
    %c0_1 = arith.constant 0 : index
    %c0_2 = arith.constant 0 : index
    %1 = vector.load %arg2[%c0_1, %c0_2] : memref<128x256xbf16, #tpu.memory_space<vmem>>, vector<128x256xbf16>
    %cst = arith.constant dense<0.000000e+00> : vector<8x256xf32>
    %2 = tpu.matmul %0, %1, %cst {dimension_numbers = #tpu.dot_dimension_numbers<[1], [0], [0], [1], [0, 0, 1, 1], [], []>} : vector<8x128xbf16>, vector<128x256xbf16>, vector<8x256xf32> -> vector<8x256xf32>
    %c0_3 = arith.constant 0 : index
    %c0_4 = arith.constant 0 : index
    %3 = vector.load %arg3[%c0_3, %c0_4] : memref<1x256xf32, #tpu.memory_space<vmem>>, vector<1x256xf32>
    %4 = vector.broadcast %3 : vector<1x256xf32> to vector<8x256xf32>
    %5 = arith.addf %2, %4 : vector<8x256xf32>
    %cst_5 = arith.constant 0.000000e+00 : f32
    %6 = vector.broadcast %cst_5 : f32 to vector<8x256xf32>
    %7 = arith.cmpf ogt, %5, %6 : vector<8x256xf32>
    %cst_6 = arith.constant 0.00999999977 : f32
    %8 = vector.broadcast %cst_6 : f32 to vector<8x256xf32>
    %9 = arith.mulf %8, %5 : vector<8x256xf32>
    %10 = arith.select %7, %5, %9 : vector<8x256xi1>, vector<8x256xf32>
    %11 = arith.truncf %10 : vector<8x256xf32> to vector<8x256xbf16>
    %c0_7 = arith.constant 0 : index
    %c0_8 = arith.constant 0 : index
    %12 = vector.load %arg4[%c0_7, %c0_8] : memref<256x512xbf16, #tpu.memory_space<vmem>>, vector<256x512xbf16>
    %cst_9 = arith.constant dense<0.000000e+00> : vector<8x512xf32>
    %13 = tpu.matmul %11, %12, %cst_9 {dimension_numbers = #tpu.dot_dimension_numbers<[1], [0], [0], [1], [0, 0, 1, 1], [], []>} : vector<8x256xbf16>, vector<256x512xbf16>, vector<8x512xf32> -> vector<8x512xf32>
    %c0_10 = arith.constant 0 : index
    %c0_11 = arith.constant 0 : index
    %14 = vector.load %arg5[%c0_10, %c0_11] : memref<1x512xf32, #tpu.memory_space<vmem>>, vector<1x512xf32>
    %15 = vector.broadcast %14 : vector<1x512xf32> to vector<8x512xf32>
    %16 = arith.addf %13, %15 : vector<8x512xf32>
    %cst_12 = arith.constant 0.000000e+00 : f32
    %17 = vector.broadcast %cst_12 : f32 to vector<8x512xf32>
    %18 = arith.cmpf ogt, %16, %17 : vector<8x512xf32>
    %cst_13 = arith.constant 0.00999999977 : f32
    %19 = vector.broadcast %cst_13 : f32 to vector<8x512xf32>
    %20 = arith.mulf %19, %16 : vector<8x512xf32>
    %21 = arith.select %18, %16, %20 : vector<8x512xi1>, vector<8x512xf32>
    %22 = arith.truncf %21 : vector<8x512xf32> to vector<8x512xbf16>
    %c0_14 = arith.constant 0 : index
    %c0_15 = arith.constant 0 : index
    %23 = vector.load %arg6[%c0_14, %c0_15] : memref<512x512xbf16, #tpu.memory_space<vmem>>, vector<512x512xbf16>
    %cst_16 = arith.constant dense<0.000000e+00> : vector<8x512xf32>
    %24 = tpu.matmul %22, %23, %cst_16 {dimension_numbers = #tpu.dot_dimension_numbers<[1], [0], [0], [1], [0, 0, 1, 1], [], []>} : vector<8x512xbf16>, vector<512x512xbf16>, vector<8x512xf32> -> vector<8x512xf32>
    %c0_17 = arith.constant 0 : index
    %c0_18 = arith.constant 0 : index
    %25 = vector.load %arg7[%c0_17, %c0_18] : memref<1x512xf32, #tpu.memory_space<vmem>>, vector<1x512xf32>
    %26 = vector.broadcast %25 : vector<1x512xf32> to vector<8x512xf32>
    %27 = arith.addf %24, %26 : vector<8x512xf32>
    %cst_19 = arith.constant 0.000000e+00 : f32
    %28 = vector.broadcast %cst_19 : f32 to vector<8x512xf32>
    %29 = arith.cmpf ogt, %27, %28 : vector<8x512xf32>
    %cst_20 = arith.constant 0.00999999977 : f32
    %30 = vector.broadcast %cst_20 : f32 to vector<8x512xf32>
    %31 = arith.mulf %30, %27 : vector<8x512xf32>
    %32 = arith.select %29, %27, %31 : vector<8x512xi1>, vector<8x512xf32>
    %33 = arith.truncf %32 : vector<8x512xf32> to vector<8x512xbf16>
    %c0_21 = arith.constant 0 : index
    %c0_22 = arith.constant 0 : index
    %34 = vector.load %arg8[%c0_21, %c0_22] : memref<512x768xbf16, #tpu.memory_space<vmem>>, vector<512x768xbf16>
    %cst_23 = arith.constant dense<0.000000e+00> : vector<8x768xf32>
    %35 = tpu.matmul %33, %34, %cst_23 {dimension_numbers = #tpu.dot_dimension_numbers<[1], [0], [0], [1], [0, 0, 1, 1], [], []>} : vector<8x512xbf16>, vector<512x768xbf16>, vector<8x768xf32> -> vector<8x768xf32>
    %c0_24 = arith.constant 0 : index
    %c0_25 = arith.constant 0 : index
    %36 = vector.load %arg9[%c0_24, %c0_25] : memref<1x768xf32, #tpu.memory_space<vmem>>, vector<1x768xf32>
    %37 = vector.broadcast %36 : vector<1x768xf32> to vector<8x768xf32>
    %38 = arith.addf %35, %37 : vector<8x768xf32>
    %cst_26 = arith.constant 0.000000e+00 : f32
    %39 = vector.broadcast %cst_26 : f32 to vector<8x768xf32>
    %40 = arith.cmpf ogt, %38, %39 : vector<8x768xf32>
    %cst_27 = arith.constant 0.00999999977 : f32
    %41 = vector.broadcast %cst_27 : f32 to vector<8x768xf32>
    %42 = arith.mulf %41, %38 : vector<8x768xf32>
    %43 = arith.select %40, %38, %42 : vector<8x768xi1>, vector<8x768xf32>
    %c0_28 = arith.constant 0 : index
    %c0_29 = arith.constant 0 : index
    %44 = vector.load %arg10[%c0_28, %c0_29] : memref<8x768xf32, #tpu.memory_space<vmem>>, vector<8x768xf32>
    tpu.vector_store %arg10[%c0_28, %c0_29], %43 {strides = array<i32>} : memref<8x768xf32, #tpu.memory_space<vmem>>, vector<8x768xf32>,
    return
  }
  func.func @transform_0(%arg0: i32) -> (i32, i32) {
    %c0_i32 = arith.constant 0 : i32
    %c0_i32_0 = arith.constant 0 : i32
    return %arg0, %c0_i32 : i32, i32
  }
  func.func @transform_1(%arg0: i32) -> (i32, i32) {
    %c0_i32 = arith.constant 0 : i32
    %c0_i32_0 = arith.constant 0 : i32
    %c0_i32_1 = arith.constant 0 : i32
    return %c0_i32, %c0_i32_0 : i32, i32
  }
  func.func @transform_2(%arg0: i32) -> (i32, i32) {
    %c0_i32 = arith.constant 0 : i32
    %c0_i32_0 = arith.constant 0 : i32
    %c0_i32_1 = arith.constant 0 : i32
    return %c0_i32, %c0_i32_0 : i32, i32
  }
  func.func @transform_3(%arg0: i32) -> (i32, i32) {
    %c0_i32 = arith.constant 0 : i32
    %c0_i32_0 = arith.constant 0 : i32
    %c0_i32_1 = arith.constant 0 : i32
    return %c0_i32, %c0_i32_0 : i32, i32
  }
  func.func @transform_4(%arg0: i32) -> (i32, i32) {
    %c0_i32 = arith.constant 0 : i32
    %c0_i32_0 = arith.constant 0 : i32
    %c0_i32_1 = arith.constant 0 : i32
    return %c0_i32, %c0_i32_0 : i32, i32
  }
  func.func @transform_5(%arg0: i32) -> (i32, i32) {
    %c0_i32 = arith.constant 0 : i32
    %c0_i32_0 = arith.constant 0 : i32
    %c0_i32_1 = arith.constant 0 : i32
    return %c0_i32, %c0_i32_0 : i32, i32
  }
  func.func @transform_6(%arg0: i32) -> (i32, i32) {
    %c0_i32 = arith.constant 0 : i32
    %c0_i32_0 = arith.constant 0 : i32
    %c0_i32_1 = arith.constant 0 : i32
    return %c0_i32, %c0_i32_0 : i32, i32
  }
  func.func @transform_7(%arg0: i32) -> (i32, i32) {
    %c0_i32 = arith.constant 0 : i32
    %c0_i32_0 = arith.constant 0 : i32
    %c0_i32_1 = arith.constant 0 : i32
    return %c0_i32, %c0_i32_0 : i32, i32
  }
  func.func @transform_8(%arg0: i32) -> (i32, i32) {
    %c0_i32 = arith.constant 0 : i32
    %c0_i32_0 = arith.constant 0 : i32
    %c0_i32_1 = arith.constant 0 : i32
    return %c0_i32, %c0_i32_0 : i32, i32
  }
  func.func @transform_9(%arg0: i32) -> (i32, i32) {
    %c0_i32 = arith.constant 0 : i32
    %c0_i32_0 = arith.constant 0 : i32
    return %arg0, %c0_i32 : i32, i32
  }
}

</mosaic_0001>

<bundles_post_ra>
// kernel: tpu_custom_call.1
= control target key start
LH: loop header
LB: loop body
LE: loop exit
PB: predicated region body
PF: predicated region fallthrough
CT: control target
= control target key end

     0   :  { %14 = vsyncpa [#allocation3], 0  ;;  %s4538_s0 = inlined_call_operand.hbm [shape: bf16[8,128], index: 0, kind: input, shape index: {}]   ;;  %s4539_s1 = inlined_call_operand.hbm [shape: bf16[128,256], index: 1, kind: input, shape index: {}]   ;;  %s4540_s2 = inlined_call_operand.vmem [shape: f32[1,256], index: 2, kind: input, shape index: {}]   ;;  %s4541_s3 = inlined_call_operand.hbm [shape: bf16[256,512], index: 3, kind: input, shape index: {}]   ;;  %s4542_s4 = inlined_call_operand.vmem [shape: f32[1,512], index: 4, kind: input, shape index: {}]   ;;  %s4543_s5 = inlined_call_operand.hbm [shape: bf16[512,512], index: 5, kind: input, shape index: {}]   ;;  %s4544_s6 = inlined_call_operand.hbm [shape: f32[1,512], index: 6, kind: input, shape index: {}]   ;;  %s4545_s7 = inlined_call_operand.hbm [shape: bf16[512,768], index: 7, kind: input, shape index: {}]   ;;  %s4546_s8 = inlined_call_operand.vmem [shape: f32[1,768], index: 8, kind: input, shape index: {}]   ;;  %s4547_s9 = inlined_call_operand.hbm [shape: f32[8,768], index: 9, kind: output, shape index: {}]  }
   0x1   :  { %15 = vsyncpa [#allocation6], 0 }
   0x2   :  { %16 = vsyncpa [#allocation9], 0 }
   0x3   :  { %17 = vsyncpa [#allocation12], 0 }
   0x4   :  { %18 = vsyncpa [#allocation4], 0  ;;  %s4380_s30 = smov [#allocation5]  }
   0x5   :  { %s34_s10 = sshll.u32 %s4380_s30, 4  ;;  %s35_s10 = int_to_ptr.vmem [resolvable:$true] %s34_s10 }
   0x6   :  { %s4238_s11 = scalar_lea.vmem %s35_s10, 2048  ;;  %p4243_p1 = scmp.lt.s32.totalorder %s35_s10, %s35_s10 }
   0x7   :  { %p4239_p0 = scmp.ne.s32.totalorder %s35_s10, %s4238_s11  ;;  %p4244_p2 = scmp.lt.s32.totalorder %s4238_s11, %s4238_s11 }
   0x9   :  { %p4245_p3 = por %p4244_p2, %p4243_p1 }
   0xb   :  { %p4246_p4 = pnand %p4245_p3, %p4239_p0 }
   0xd   :  { %4249 = shalt.err (!%p4246_p4)
}
   0xe   :  { %s4381_s12 = smov 128   ;;  %s4382_s13 = smov 8  }
   0xf   :  { %40 = dma.hbm_to_vmem [thread:$0]  %s4539_s1, 2048, %s35_s10, [#allocation6], %s4381_s12, %s4381_s12, %s4382_s13  }
  0x10   :  { %s4383_s16 = smov [#allocation8]   ;;  %s4384_s18 = smov [#allocation2]  }
  0x11   :  { %s62_s17 = sshll.u32 %s4383_s16, 4  ;;  %s25_s19 = sshll.u32 %s4384_s18, 4  ;;  %s63_s17 = int_to_ptr.vmem [resolvable:$true] %s62_s17  ;;  %s26_s19 = int_to_ptr.vmem [resolvable:$true] %s25_s19 }
  0x12   :  { %s4258_s20 = scalar_lea.vmem %s63_s17, 16384  ;;  %p4263_p6 = scmp.lt.s32.totalorder %s63_s17, %s63_s17 }
  0x13   :  { %p4259_p5 = scmp.ne.s32.totalorder %s63_s17, %s4258_s20  ;;  %p4264_p7 = scmp.lt.s32.totalorder %s4258_s20, %s4258_s20 }
  0x15   :  { %p4265_p8 = por %p4264_p7, %p4263_p6 }
  0x17   :  { %p4266_p9 = pnand %p4265_p8, %p4259_p5 }
  0x19   :  { %4269 = shalt.err (!%p4266_p9)
}
  0x1a   :  { %s4385_s21 = smov 256   ;;  %s4386_s22 = smov 16  }
  0x1b   :  { %68 = dma.hbm_to_vmem [thread:$0]  %s4543_s5, 16384, %s63_s17, [#allocation9], %s4385_s21, %s4385_s21, %s4386_s22  }
  0x1c   :  { %s4278_s1 = scalar_lea.vmem %s26_s19, 64  ;;  %p4283_p11 = scmp.lt.s32.totalorder %s26_s19, %s26_s19 }
  0x1d   :  { %p4279_p10 = scmp.ne.s32.totalorder %s26_s19, %s4278_s1  ;;  %p4284_p12 = scmp.lt.s32.totalorder %s4278_s1, %s4278_s1 }
  0x1f   :  { %p4285_p13 = por %p4284_p12, %p4283_p11 }
  0x21   :  { %p4286_p0 = pnand %p4285_p13, %p4279_p10 }
  0x23   :  { %4289 = shalt.err (!%p4286_p0)
}
  0x24   :  { %28 = dma.hbm_to_vmem [thread:$0]  %s4538_s0, 64, %s26_s19, [#allocation3]  }
  0x25   :  { %s4387_s27 = smov [#allocation7]   ;;  %s4388_s29 = smov [#allocation10]  }
  0x26   :  { %s48_s28 = sshll.u32 %s4387_s27, 4  ;;  %s75_s30 = sshll.u32 %s4388_s29, 4  ;;  %s49_s28 = int_to_ptr.vmem [resolvable:$true] %s48_s28  ;;  %s76_s30 = int_to_ptr.vmem [resolvable:$true] %s75_s30 }
  0x27   :  { %s4298_s10 = scalar_lea.vmem %s49_s28, 8192  ;;  %p4303_p2 = scmp.lt.s32.totalorder %s49_s28, %s49_s28 }
  0x28   :  { %p4299_p1 = scmp.ne.s32.totalorder %s49_s28, %s4298_s10  ;;  %p4304_p3 = scmp.lt.s32.totalorder %s4298_s10, %s4298_s10 }
  0x2a   :  { %p4305_p4 = por %p4304_p3, %p4303_p2 }
  0x2c   :  { %p4306_p5 = pnand %p4305_p4, %p4299_p1 }
  0x2e   :  { %4309 = shalt.err (!%p4306_p5)
}
  0x2f   :  { %54 = dma.hbm_to_vmem [thread:$0]  %s4541_s3, 8192, %s49_s28, [#allocation6], %s4385_s21, %s4385_s21, %s4386_s22  }
  0x30   :  { %s4318_s12 = scalar_lea.vmem %s76_s30, 64  ;;  %p4323_p7 = scmp.lt.s32.totalorder %s76_s30, %s76_s30 }
  0x31   :  { %p4319_p6 = scmp.ne.s32.totalorder %s76_s30, %s4318_s12  ;;  %p4324_p8 = scmp.lt.s32.totalorder %s4318_s12, %s4318_s12 }
  0x33   :  { %p4325_p9 = por %p4324_p8, %p4323_p7 }
  0x35   :  { %p4326_p10 = pnand %p4325_p9, %p4319_p6 }
  0x37   :  { %4329 = shalt.err (!%p4326_p10)
}
  0x38   :  { %78 = dma.hbm_to_vmem [thread:$0]  %s4544_s6, 64, %s76_s30, [#allocation9]  }
  0x39   :  { %s4389_s14 = smov [#allocation11]  }
  0x3a   :  { %s84_s15 = sshll.u32 %s4389_s14, 4  ;;  %s85_s15 = int_to_ptr.vmem [resolvable:$true] %s84_s15 }
  0x3b   :  { %s4338_s16 = scalar_lea.vmem %s85_s15, 24576  ;;  %p4343_p12 = scmp.lt.s32.totalorder %s85_s15, %s85_s15 }
  0x3c   :  { %p4339_p11 = scmp.ne.s32.totalorder %s85_s15, %s4338_s16  ;;  %p4344_p13 = scmp.lt.s32.totalorder %s4338_s16, %s4338_s16 }
  0x3e   :  { %p4345_p0 = por %p4344_p13, %p4343_p12 }
  0x40   :  { %p4346_p1 = pnand %p4345_p0, %p4339_p11 }
  0x42   :  { %4349 = shalt.err (!%p4346_p1)
}
  0x43   :  { %s4390_s3 = smov 384   ;;  %s4391_s17 = smov 24  }
  0x44   :  { %90 = dma.hbm_to_vmem [thread:$0]  %s4545_s7, 24576, %s85_s15, [#allocation12], %s4390_s3, %s4390_s3, %s4391_s17  }
  0x45   :  { %4370 = dma.done.wait [#allocation3], 64  }
  0x46   :  { %4371 = vsyncadd [#allocation3], 4294967232 }
  0x47   :  { %4372 = dma.done.wait [#allocation6], 10240  }
  0x48   :  { %4373 = vsyncadd [#allocation6], 4294957056 }
  0x49   :  { %4374 = dma.done.wait [#allocation9], 16448  }
  0x4a   :  { %4375 = vsyncadd [#allocation9], 4294950848 }
  0x4b   :  { %4376 = dma.done.wait [#allocation12], 24576  }
  0x4c   :  { %4377 = vsyncadd [#allocation12], 4294942720  ;;  %v4392_v0 = vmov 0   ;;  %v3630_v1 = vld [vmem:[#allocation5 + $0x74] ss:$8 sps:$4 sm:$0xff]  }
  0x4d   :  { %253 = vmatprep.mubr.bf16.mxu0 %v4392_v0  ;;  %v3632_v2 = vld [vmem:[#allocation5 + $0x70] ss:$8 sps:$4 sm:$0xff]   ;;  %221 = vmatprep.subr.bf16.mxu0 %v3630_v1  ;;  %v3633_v3 = vld [vmem:[#allocation5 + $0x64] ss:$8 sps:$4 sm:$0xff]   ;;  %v3635_v4 = vld [vmem:[#allocation5 + $0x60] ss:$8 sps:$4 sm:$0xff]  }
  0x4e   :  { %222 = vmatpush1.bf16.msra.mxu0 %v3632_v2  ;;  %v3636_v5 = vld [vmem:[#allocation5 + $0x54] ss:$8 sps:$4 sm:$0xff]   ;;  %v3638_v6 = vld [vmem:[#allocation5 + $0x50] ss:$8 sps:$4 sm:$0xff]   ;;  %v3639_v7 = vld [vmem:[#allocation5 + $0x44] ss:$8 sps:$4 sm:$0xff]  }
  0x4f   :  { %223 = vmatprep.subr.bf16.mxu0 %v3633_v3  ;;  %v3641_v8 = vld [vmem:[#allocation5 + $0x40] ss:$8 sps:$4 sm:$0xff]   ;;  %v3654_v9 = vld [vmem:[#allocation7 + $0xe4] ss:$16 sps:$4 sm:$0xff]   ;;  %v3644_v13 = vld [vmem:[#allocation5 + $0x30] ss:$8 sps:$4 sm:$0xff]  }
  0x50   :  { %v3642_v10 = vld [vmem:[#allocation5 + $0x34] ss:$8 sps:$4 sm:$0xff]   ;;  %676 = vmatprep.subr.bf16.mxu1 %v3654_v9  ;;  %v3659_v11 = vld [vmem:[#allocation7 + $0xe0] ss:$16 sps:$4 sm:$0xff]   ;;  %v3645_v14 = vld [vmem:[#allocation5 + $0x24] ss:$8 sps:$4 sm:$0xff]  }
  0x51   :  { %v3660_v12 = vld [vmem:[#allocation7 + $0xc4] ss:$16 sps:$4 sm:$0xff]   ;;  %677 = vmatpush1.bf16.msra.mxu1 %v3659_v11  ;;  %v3665_v15 = vld [vmem:[#allocation7 + $0xc0] ss:$16 sps:$4 sm:$0xff]   ;;  %v3658_v26 = vld [vmem:[#allocation7 + $0xec] ss:$16 sps:$4 sm:$0xff]  }
  0x52   :  { %224 = vmatpush1.bf16.msra.mxu0 %v3635_v4  ;;  %678 = vmatprep.subr.bf16.mxu1 %v3660_v12  ;;  %v3666_v16 = vld [vmem:[#allocation7 + $0xa4] ss:$16 sps:$4 sm:$0xff]   ;;  %v3647_v17 = vld [vmem:[#allocation5 + $0x20] ss:$8 sps:$4 sm:$0xff]   ;;  %v3650_v21 = vld [vmem:[#allocation5 + $0x10] ss:$8 sps:$4 sm:$0xff]  }
  0x53   :  { %225 = vmatprep.subr.bf16.mxu0 %v3636_v5  ;;  %v3648_v18 = vld [vmem:[#allocation5 + $0x14] ss:$8 sps:$4 sm:$0xff]   ;;  %v3671_v19 = vld [vmem:[#allocation7 + $0xa0] ss:$16 sps:$4 sm:$0xff]   ;;  %v3651_v22 = vld [vmem:[#allocation5 + $0x4] ss:$8 sps:$4 sm:$0xff]  }
  0x54   :  { %v3672_v20 = vld [vmem:[#allocation7 + $0x84] ss:$16 sps:$4 sm:$0xff]   ;;  %v3677_v23 = vld [vmem:[#allocation7 + $0x80] ss:$16 sps:$4 sm:$0xff]   ;;  %v112_v29 = vld [vmem:[#allocation2] sm:$0xf] }
  0x55   :  { %679 = vmatpush1.bf16.msra.mxu1 %v3665_v15  ;;  %v3678_v24 = vld [vmem:[#allocation7 + $0x64] ss:$16 sps:$4 sm:$0xff]   ;;  %v3653_v25 = vld [vmem:[#allocation5] ss:$8 sps:$4 sm:$0xff]   ;;  %v3664_v31 = vld [vmem:[#allocation7 + $0xcc] ss:$16 sps:$4 sm:$0xff]  }
  0x56   :  { %226 = vmatpush1.bf16.msra.mxu0 %v3638_v6  ;;  %680 = vmatprep.subr.bf16.mxu1 %v3666_v16  ;;  %v3683_v27 = vld [vmem:[#allocation7 + $0x60] ss:$16 sps:$4 sm:$0xff]   ;;  %v3684_v28 = vld [vmem:[#allocation7 + $0x44] ss:$16 sps:$4 sm:$0xff]   ;;  %v3656_v30 = vld [vmem:[#allocation7 + $0xe8] ss:$16 sps:$4 sm:$0xff]  }
  0x57   :  { %227 = vmatprep.subr.bf16.mxu0 %v3639_v7  ;;  %v3689_v32 = vld [vmem:[#allocation7 + $0x40] ss:$16 sps:$4 sm:$0xff]   ;;  %v3690_v33 = vld [vmem:[#allocation7 + $0x24] ss:$16 sps:$4 sm:$0xff]   ;;  %v3662_v34 = vld [vmem:[#allocation7 + $0xc8] ss:$16 sps:$4 sm:$0xff]  }
  0x58   :  { %v3670_v35 = vld [vmem:[#allocation7 + $0xac] ss:$16 sps:$4 sm:$0xff]   ;;  %v3695_v36 = vld [vmem:[#allocation7 + $0x20] ss:$16 sps:$4 sm:$0xff]   ;;  %v3696_v37 = vld [vmem:[#allocation7 + $0x4] ss:$16 sps:$4 sm:$0xff]  }
  0x59   :  { %681 = vmatpush1.bf16.msra.mxu1 %v3671_v19  ;;  %v3668_v38 = vld [vmem:[#allocation7 + $0xa8] ss:$16 sps:$4 sm:$0xff]   ;;  %v3676_v39 = vld [vmem:[#allocation7 + $0x8c] ss:$16 sps:$4 sm:$0xff]   ;;  %v3701_v40 = vld [vmem:[#allocation7] ss:$16 sps:$4 sm:$0xff]  }
  0x5a   :  { %228 = vmatpush1.bf16.msra.mxu0 %v3641_v8  ;;  %682 = vmatprep.subr.bf16.mxu1 %v3672_v20  ;;  %v3702_v41 = vld [vmem:[#allocation7 + $0x1e4] ss:$16 sps:$4 sm:$0xff]   ;;  %v3674_v42 = vld [vmem:[#allocation7 + $0x88] ss:$16 sps:$4 sm:$0xff]   ;;  %v3682_v43 = vld [vmem:[#allocation7 + $0x6c] ss:$16 sps:$4 sm:$0xff]   ;;  %v131_v20 = vlaneseq }
  0x5b   :  { %229 = vmatprep.subr.bf16.mxu0 %v3642_v10  ;;  %v3707_v44 = vld [vmem:[#allocation7 + $0x1e0] ss:$16 sps:$4 sm:$0xff]   ;;  %v3708_v45 = vld [vmem:[#allocation7 + $0x1c4] ss:$16 sps:$4 sm:$0xff]   ;;  %v3680_v46 = vld [vmem:[#allocation7 + $0x68] ss:$16 sps:$4 sm:$0xff]  }
  0x5c   :  { %v3688_v47 = vld [vmem:[#allocation7 + $0x4c] ss:$16 sps:$4 sm:$0xff]   ;;  %v3713_v48 = vld [vmem:[#allocation7 + $0x1c0] ss:$16 sps:$4 sm:$0xff]   ;;  %v3714_v49 = vld [vmem:[#allocation7 + $0x1a4] ss:$16 sps:$4 sm:$0xff]  }
  0x5d   :  { %683 = vmatpush1.bf16.msra.mxu1 %v3677_v23  ;;  %v3686_v50 = vld [vmem:[#allocation7 + $0x48] ss:$16 sps:$4 sm:$0xff]   ;;  %v3719_v51 = vld [vmem:[#allocation7 + $0x1a0] ss:$16 sps:$4 sm:$0xff]   ;;  %v3694_v52 = vld [vmem:[#allocation7 + $0x2c] ss:$16 sps:$4 sm:$0xff]  }
  0x5e   :  { %230 = vmatpush1.bf16.msra.mxu0 %v3644_v13  ;;  %684 = vmatprep.subr.bf16.mxu1 %v3678_v24  ;;  %v3720_v53 = vld [vmem:[#allocation7 + $0x184] ss:$16 sps:$4 sm:$0xff]   ;;  %v3692_v54 = vld [vmem:[#allocation7 + $0x28] ss:$16 sps:$4 sm:$0xff]   ;;  %v3725_v55 = vld [vmem:[#allocation7 + $0x180] ss:$16 sps:$4 sm:$0xff]  }
  0x5f   :  { %231 = vmatprep.subr.bf16.mxu0 %v3645_v14  ;;  %v3700_v56 = vld [vmem:[#allocation7 + $0xc] ss:$16 sps:$4 sm:$0xff]   ;;  %v3726_v57 = vld [vmem:[#allocation7 + $0x164] ss:$16 sps:$4 sm:$0xff]   ;;  %v3698_v58 = vld [vmem:[#allocation7 + $0x8] ss:$16 sps:$4 sm:$0xff]  }
  0x60   :  { %v3731_v59 = vld [vmem:[#allocation7 + $0x160] ss:$16 sps:$4 sm:$0xff]   ;;  %v3706_v60 = vld [vmem:[#allocation7 + $0x1ec] ss:$16 sps:$4 sm:$0xff]   ;;  %v3732_v61 = vld [vmem:[#allocation7 + $0x144] ss:$16 sps:$4 sm:$0xff]  }
  0x61   :  { %685 = vmatpush1.bf16.msra.mxu1 %v3683_v27  ;;  %v3704_v62 = vld [vmem:[#allocation7 + $0x1e8] ss:$16 sps:$4 sm:$0xff]   ;;  %v3712_v63 = vld [vmem:[#allocation7 + $0x1cc] ss:$16 sps:$4 sm:$0xff]   ;;  %v3737_v9 = vld [vmem:[#allocation7 + $0x140] ss:$16 sps:$4 sm:$0xff]  }
  0x62   :  { %232 = vmatpush1.bf16.msra.mxu0 %v3647_v17  ;;  %686 = vmatprep.subr.bf16.mxu1 %v3684_v28  ;;  %v3710_v0 = vld [vmem:[#allocation7 + $0x1c8] ss:$16 sps:$4 sm:$0xff]   ;;  %v3718_v1 = vld [vmem:[#allocation7 + $0x1ac] ss:$16 sps:$4 sm:$0xff]   ;;  %v3738_v10 = vld [vmem:[#allocation7 + $0x124] ss:$16 sps:$4 sm:$0xff]  }
  0x63   :  { %233 = vmatprep.subr.bf16.mxu0 %v3648_v18  ;;  %v3716_v2 = vld [vmem:[#allocation7 + $0x1a8] ss:$16 sps:$4 sm:$0xff]   ;;  %v3724_v3 = vld [vmem:[#allocation7 + $0x18c] ss:$16 sps:$4 sm:$0xff]   ;;  %v3743_v13 = vld [vmem:[#allocation7 + $0x120] ss:$16 sps:$4 sm:$0xff]  }
  0x64   :  { %v3722_v4 = vld [vmem:[#allocation7 + $0x188] ss:$16 sps:$4 sm:$0xff]   ;;  %v3730_v5 = vld [vmem:[#allocation7 + $0x16c] ss:$16 sps:$4 sm:$0xff]   ;;  %v3744_v14 = vld [vmem:[#allocation7 + $0x104] ss:$16 sps:$4 sm:$0xff]  }
  0x65   :  { %687 = vmatpush1.bf16.msra.mxu1 %v3689_v32  ;;  %v3728_v6 = vld [vmem:[#allocation7 + $0x168] ss:$16 sps:$4 sm:$0xff]   ;;  %v3736_v7 = vld [vmem:[#allocation7 + $0x14c] ss:$16 sps:$4 sm:$0xff]   ;;  %v3749_v17 = vld [vmem:[#allocation7 + $0x100] ss:$16 sps:$4 sm:$0xff]  }
  0x66   :  { %234 = vmatpush1.bf16.msra.mxu0 %v3650_v21  ;;  %688 = vmatprep.subr.bf16.mxu1 %v3690_v33  ;;  %v3734_v8 = vld [vmem:[#allocation7 + $0x148] ss:$16 sps:$4 sm:$0xff]   ;;  %v3742_v11 = vld [vmem:[#allocation7 + $0x12c] ss:$16 sps:$4 sm:$0xff]   ;;  %v3752_v18 = vld [vmem:[#allocation8 + $0xe4] ss:$16 sps:$4 sm:$0xff]  }
  0x67   :  { %235 = vmatprep.subr.bf16.mxu0 %v3651_v22  ;;  %v3740_v12 = vld [vmem:[#allocation7 + $0x128] ss:$16 sps:$4 sm:$0xff]   ;;  %v3748_v15 = vld [vmem:[#allocation7 + $0x10c] ss:$16 sps:$4 sm:$0xff]   ;;  %v3755_v19 = vld [vmem:[#allocation8 + $0x2e4] ss:$16 sps:$4 sm:$0xff]  }
  0x68   :  { %v3746_v16 = vld [vmem:[#allocation7 + $0x108] ss:$16 sps:$4 sm:$0xff]   ;;  %v4462_v21 = vshrl.u32 %v131_v20, 7  ;;  %v129_v23 = vld [vmem:[%s4540_s2] sm:$0x3] }
  0x69   :  { %689 = vmatpush1.bf16.msra.mxu1 %v3695_v36  ;;  %v3819_v20 = vld [vmem:[#allocation8 + $0x380] ss:$16 sps:$4 sm:$0xff]  }
  0x6a   :  { %236 = vmatpush1.bf16.msra.mxu0 %v3653_v25  ;;  %690 = vmatprep.subr.bf16.mxu1 %v3696_v37  ;;  %v4465_v22 = vsub.s32 0, %v4462_v21  ;;  %v4471_v24 = vsub.s32 1, %v4462_v21 }
  0x6b   :  { %717 = vmatprep.subr.bf16.mxu0 %v3658_v26 }
  0x6c   :  { %v134_v25 = vrot.slane %v129_v23, %v4465_v22  ;;  %v138_v26 = vrot.slane %v129_v23, %v4471_v24  ;;  %v3824_v23 = vld [vmem:[#allocation8 + $0x164] ss:$16 sps:$4 sm:$0xff]  }
  0x6d   :  { %254 = vmatmul.mubr.bf16.vlgmr.msra.gmra.mxu0 %v112_v29  ;;  %691 = vmatpush1.bf16.msra.mxu1 %v3701_v40 }
  0x6e   :  { %718 = vmatpush1.bf16.msra.mxu0 %v3656_v30  ;;  %692 = vmatprep.subr.bf16.mxu1 %v3702_v41  ;;  %v3758_v41 = vld [vmem:[#allocation8 + $0xc4] ss:$16 sps:$4 sm:$0xff]  }
  0x6f   :  { %719 = vmatprep.subr.bf16.mxu0 %v3664_v31 }
  0x71   :  { %693 = vmatpush2.bf16.msra.mxu1 %v3707_v44  ;;  %v3759_v44 = vld [vmem:[#allocation8 + $0x2c0] ss:$16 sps:$4 sm:$0xff]  }
  0x72   :  { %720 = vmatpush1.bf16.msra.mxu0 %v3662_v34  ;;  %694 = vmatprep.subr.bf16.mxu1 %v3708_v45  ;;  %v3764_v45 = vld [vmem:[#allocation8 + $0xa4] ss:$16 sps:$4 sm:$0xff]  }
  0x73   :  { %721 = vmatprep.subr.bf16.mxu0 %v3670_v35 }
  0x75   :  { %695 = vmatpush2.bf16.msra.mxu1 %v3713_v48  ;;  %v3765_v48 = vld [vmem:[#allocation8 + $0x2a0] ss:$16 sps:$4 sm:$0xff]  }
  0x76   :  { %722 = vmatpush1.bf16.msra.mxu0 %v3668_v38  ;;  %696 = vmatprep.subr.bf16.mxu1 %v3714_v49  ;;  %v3750_v38 = vld [vmem:[#allocation8 + $0xe0] ss:$16 sps:$4 sm:$0xff]   ;;  %v3770_v49 = vld [vmem:[#allocation8 + $0x84] ss:$16 sps:$4 sm:$0xff]  }
  0x77   :  { %723 = vmatprep.subr.bf16.mxu0 %v3676_v39  ;;  %v3753_v39 = vld [vmem:[#allocation8 + $0x2e0] ss:$16 sps:$4 sm:$0xff]  }
  0x79   :  { %697 = vmatpush2.bf16.msra.mxu1 %v3719_v51  ;;  %v3768_v51 = vld [vmem:[#allocation8 + $0x80] ss:$16 sps:$4 sm:$0xff]  }
  0x7a   :  { %724 = vmatpush1.bf16.msra.mxu0 %v3674_v42  ;;  %698 = vmatprep.subr.bf16.mxu1 %v3720_v53  ;;  %v3761_v42 = vld [vmem:[#allocation8 + $0x2c4] ss:$16 sps:$4 sm:$0xff]  }
  0x7b   :  { %725 = vmatprep.subr.bf16.mxu0 %v3682_v43  ;;  %v3756_v43 = vld [vmem:[#allocation8 + $0xc0] ss:$16 sps:$4 sm:$0xff]   ;;  %v3776_v53 = vld [vmem:[#allocation8 + $0x64] ss:$16 sps:$4 sm:$0xff]  }
  0x7d   :  { %699 = vmatpush2.bf16.msra.mxu1 %v3725_v55  ;;  %v3774_v55 = vld [vmem:[#allocation8 + $0x60] ss:$16 sps:$4 sm:$0xff]  }
  0x7e   :  { %726 = vmatpush1.bf16.msra.mxu0 %v3680_v46  ;;  %700 = vmatprep.subr.bf16.mxu1 %v3726_v57  ;;  %v3767_v46 = vld [vmem:[#allocation8 + $0x2a4] ss:$16 sps:$4 sm:$0xff]  }
  0x7f   :  { %727 = vmatprep.subr.bf16.mxu0 %v3688_v47  ;;  %v3762_v47 = vld [vmem:[#allocation8 + $0xa0] ss:$16 sps:$4 sm:$0xff]   ;;  %v3782_v57 = vld [vmem:[#allocation8 + $0x44] ss:$16 sps:$4 sm:$0xff]  }
  0x81   :  { %701 = vmatpush2.bf16.msra.mxu1 %v3731_v59  ;;  %v3780_v59 = vld [vmem:[#allocation8 + $0x40] ss:$16 sps:$4 sm:$0xff]  }
  0x82   :  { %728 = vmatpush1.bf16.msra.mxu0 %v3686_v50  ;;  %702 = vmatprep.subr.bf16.mxu1 %v3732_v61  ;;  %v3773_v50 = vld [vmem:[#allocation8 + $0x284] ss:$16 sps:$4 sm:$0xff]  }
  0x83   :  { %729 = vmatprep.subr.bf16.mxu0 %v3694_v52  ;;  %v3771_v52 = vld [vmem:[#allocation8 + $0x280] ss:$16 sps:$4 sm:$0xff]   ;;  %v3788_v61 = vld [vmem:[#allocation8 + $0x24] ss:$16 sps:$4 sm:$0xff]  }
  0x85   :  { %703 = vmatpush2.bf16.msra.mxu1 %v3737_v9  ;;  %v3806_v9 = vld [vmem:[#allocation8 + $0x1c4] ss:$16 sps:$4 sm:$0xff]  }
  0x86   :  { %730 = vmatpush1.bf16.msra.mxu0 %v3692_v54  ;;  %704 = vmatprep.subr.bf16.mxu1 %v3738_v10  ;;  %v3779_v54 = vld [vmem:[#allocation8 + $0x264] ss:$16 sps:$4 sm:$0xff]  }
  0x87   :  { %731 = vmatprep.subr.bf16.mxu0 %v3700_v56  ;;  %v3777_v56 = vld [vmem:[#allocation8 + $0x260] ss:$16 sps:$4 sm:$0xff]   ;;  %v3809_v10 = vld [vmem:[#allocation8 + $0x3c4] ss:$16 sps:$4 sm:$0xff]  }
  0x89   :  { %705 = vmatpush2.bf16.msra.mxu1 %v3743_v13  ;;  %v3812_v13 = vld [vmem:[#allocation8 + $0x1a4] ss:$16 sps:$4 sm:$0xff]  }
  0x8a   :  { %732 = vmatpush1.bf16.msra.mxu0 %v3698_v58  ;;  %706 = vmatprep.subr.bf16.mxu1 %v3744_v14  ;;  %v3785_v58 = vld [vmem:[#allocation8 + $0x244] ss:$16 sps:$4 sm:$0xff]  }
  0x8b   :  { %733 = vmatprep.subr.bf16.mxu0 %v3706_v60  ;;  %v3783_v60 = vld [vmem:[#allocation8 + $0x240] ss:$16 sps:$4 sm:$0xff]   ;;  %v3815_v14 = vld [vmem:[#allocation8 + $0x3a4] ss:$16 sps:$4 sm:$0xff]  }
  0x8d   :  { %707 = vmatpush2.bf16.msra.mxu1 %v3749_v17  ;;  %v3818_v17 = vld [vmem:[#allocation8 + $0x184] ss:$16 sps:$4 sm:$0xff]  }
  0x8e   :  { %734 = vmatpush2.bf16.msra.mxu0 %v3704_v62  ;;  %1564 = vmatprep.subr.bf16.mxu1 %v3752_v18  ;;  %v3791_v62 = vld [vmem:[#allocation8 + $0x224] ss:$16 sps:$4 sm:$0xff]  }
  0x8f   :  { %735 = vmatprep.subr.bf16.mxu0 %v3712_v63  ;;  %v3786_v63 = vld [vmem:[#allocation8 + $0x20] ss:$16 sps:$4 sm:$0xff]   ;;  %v3821_v18 = vld [vmem:[#allocation8 + $0x384] ss:$16 sps:$4 sm:$0xff]  }
  0x92   :  { %736 = vmatpush2.bf16.msra.mxu0 %v3710_v0  ;;  %v3789_v0 = vld [vmem:[#allocation8 + $0x220] ss:$16 sps:$4 sm:$0xff]  }
  0x93   :  { %737 = vmatprep.subr.bf16.mxu0 %v3718_v1  ;;  %v3794_v1 = vld [vmem:[#allocation8 + $0x4] ss:$16 sps:$4 sm:$0xff]  }
  0x96   :  { %738 = vmatpush2.bf16.msra.mxu0 %v3716_v2  ;;  %v3797_v2 = vld [vmem:[#allocation8 + $0x204] ss:$16 sps:$4 sm:$0xff]  }
  0x97   :  { %739 = vmatprep.subr.bf16.mxu0 %v3724_v3  ;;  %v3792_v3 = vld [vmem:[#allocation8] ss:$16 sps:$4 sm:$0xff]  }
  0x9a   :  { %740 = vmatpush2.bf16.msra.mxu0 %v3722_v4  ;;  %v3795_v4 = vld [vmem:[#allocation8 + $0x200] ss:$16 sps:$4 sm:$0xff]  }
  0x9b   :  { %741 = vmatprep.subr.bf16.mxu0 %v3730_v5  ;;  %v3800_v5 = vld [vmem:[#allocation8 + $0x1e4] ss:$16 sps:$4 sm:$0xff]  }
  0x9e   :  { %742 = vmatpush2.bf16.msra.mxu0 %v3728_v6  ;;  %v3803_v6 = vld [vmem:[#allocation8 + $0x3e4] ss:$16 sps:$4 sm:$0xff]  }
  0x9f   :  { %743 = vmatprep.subr.bf16.mxu0 %v3736_v7  ;;  %v3798_v7 = vld [vmem:[#allocation8 + $0x1e0] ss:$16 sps:$4 sm:$0xff]  }
  0xa2   :  { %744 = vmatpush2.bf16.msra.mxu0 %v3734_v8  ;;  %v3801_v8 = vld [vmem:[#allocation8 + $0x3e0] ss:$16 sps:$4 sm:$0xff]  }
  0xa3   :  { %745 = vmatprep.subr.bf16.mxu0 %v3742_v11  ;;  %v3804_v11 = vld [vmem:[#allocation8 + $0x1c0] ss:$16 sps:$4 sm:$0xff]  }
  0xa6   :  { %746 = vmatpush2.bf16.msra.mxu0 %v3740_v12  ;;  %v3807_v12 = vld [vmem:[#allocation8 + $0x3c0] ss:$16 sps:$4 sm:$0xff]  }
  0xa7   :  { %747 = vmatprep.subr.bf16.mxu0 %v3748_v15  ;;  %v3810_v15 = vld [vmem:[#allocation8 + $0x1a0] ss:$16 sps:$4 sm:$0xff]  }
  0xaa   :  { %748 = vmatpush2.bf16.msra.mxu0 %v3746_v16  ;;  %v3813_v16 = vld [vmem:[#allocation8 + $0x3a0] ss:$16 sps:$4 sm:$0xff]  }
  0xab   :  { %1605 = vmatprep.subr.bf16.mxu0 %v3755_v19  ;;  %v3816_v19 = vld [vmem:[#allocation8 + $0x180] ss:$16 sps:$4 sm:$0xff]  }
 0x12d   :  { %v255_v27 = vpop.f32.mrf.mxu0 }
 0x12e   :  { %v256_v28 = vadd.f32 %v255_v27, %v134_v25  ;;  %v3827_v25 = vld [vmem:[#allocation8 + $0x364] ss:$16 sps:$4 sm:$0xff]   ;;  %v3825_v27 = vld [vmem:[#allocation8 + $0x360] ss:$16 sps:$4 sm:$0xff]  }
 0x12f   :  { %v257_v29 = vpop.f32.mrf.mxu0 }
 0x130   :  { %vm262_vm0 = vcmp.gt.f32.partialorder %v256_v28, 0.0  ;;  %v264_v30 = vmul.f32 0.01, %v256_v28  ;;  %v258_v31 = vadd.f32 %v257_v29, %v138_v26  ;;  %v3822_v26 = vld [vmem:[#allocation8 + $0x160] ss:$16 sps:$4 sm:$0xff]  }
 0x131   :  { %v259_v32 = vpop.f32.mrf.mxu0  ;;  %v3833_v29 = vld [vmem:[#allocation8 + $0x344] ss:$16 sps:$4 sm:$0xff]  }
 0x132   :  { %v265_v33 = vmul.f32 0.01, %v258_v31  ;;  %vm263_vm1 = vcmp.gt.f32.partialorder %v258_v31, 0.0  ;;  %v266_v35 = vsel %vm262_vm0, %v256_v28, %v264_v30  ;;  %v3830_v28 = vld [vmem:[#allocation8 + $0x144] ss:$16 sps:$4 sm:$0xff]  }
 0x133   :  { %v260_v34 = vpop.f32.mrf.mxu0  ;;  %v268_v40 = vpack.c.bf16 %v266_v35, %v266_v35  ;;  %v3828_v30 = vld [vmem:[#allocation8 + $0x140] ss:$16 sps:$4 sm:$0xff]   ;;  %v3836_v32 = vld [vmem:[#allocation8 + $0x124] ss:$16 sps:$4 sm:$0xff]  }
 0x134   :  { %v267_v36 = vsel %vm263_vm1, %v258_v31, %v265_v33  ;;  %v3831_v31 = vld [vmem:[#allocation8 + $0x340] ss:$16 sps:$4 sm:$0xff]   ;;  %v3839_v33 = vld [vmem:[#allocation8 + $0x324] ss:$16 sps:$4 sm:$0xff]  }
 0x135   :  { %v269_v37 = vpack.c.bf16 %v267_v36, %v267_v36  ;;  %v3834_v34 = vld [vmem:[#allocation8 + $0x120] ss:$16 sps:$4 sm:$0xff]   ;;  %v3842_v36 = vld [vmem:[#allocation8 + $0x104] ss:$16 sps:$4 sm:$0xff]  }
 0x136   :  { %v3837_v35 = vld [vmem:[#allocation8 + $0x320] ss:$16 sps:$4 sm:$0xff]  }
 0x137   :  { %708 = vmatprep.mubr.bf16.mxu1 %v269_v37  ;;  %749 = vmatprep.mubr.bf16.mxu0 %v269_v37  ;;  %v3845_v37 = vld [vmem:[#allocation8 + $0x304] ss:$16 sps:$4 sm:$0xff]  }
 0x138   :  { %709 = vmatmul.mubr.bf16.vlgmr.msra.gmra.mxu1 %v268_v40  ;;  %750 = vmatmul.mubr.bf16.vlgmr.msra.gmra.mxu0 %v268_v40  ;;  %v3848_v40 = vld [vmem:[#allocation8 + $0xec] ss:$16 sps:$4 sm:$0xff]  }
 0x139   :  { %1565 = vmatpush1.bf16.msra.mxu1 %v3750_v38  ;;  %1606 = vmatpush1.bf16.msra.mxu0 %v3753_v39  ;;  %v3840_v38 = vld [vmem:[#allocation8 + $0x100] ss:$16 sps:$4 sm:$0xff]  }
 0x13a   :  { %1566 = vmatprep.subr.bf16.mxu1 %v3758_v41  ;;  %1607 = vmatprep.subr.bf16.mxu0 %v3761_v42  ;;  %v3843_v39 = vld [vmem:[#allocation8 + $0x300] ss:$16 sps:$4 sm:$0xff]   ;;  %v3851_v41 = vld [vmem:[#allocation8 + $0x2ec] ss:$16 sps:$4 sm:$0xff]   ;;  %v4476_v42 = vsub.s32 2, %v4462_v21 }
 0x13d   :  { %1567 = vmatpush1.bf16.msra.mxu1 %v3756_v43  ;;  %1608 = vmatpush1.bf16.msra.mxu0 %v3759_v44  ;;  %v334_v43 = vld [vmem:[%s4542_s4] sm:$0xf]  ;;  %v4482_v44 = vsub.s32 3, %v4462_v21 }
 0x13e   :  { %1568 = vmatprep.subr.bf16.mxu1 %v3764_v45  ;;  %1609 = vmatprep.subr.bf16.mxu0 %v3767_v46  ;;  %v339_v45 = vrot.slane %v334_v43, %v4465_v22  ;;  %v347_v46 = vrot.slane %v334_v43, %v4476_v42 }
 0x141   :  { %1569 = vmatpush1.bf16.msra.mxu1 %v3762_v47  ;;  %1610 = vmatpush1.bf16.msra.mxu0 %v3765_v48 }
 0x142   :  { %1570 = vmatprep.subr.bf16.mxu1 %v3770_v49  ;;  %1611 = vmatprep.subr.bf16.mxu0 %v3773_v50  ;;  %v343_v49 = vrot.slane %v334_v43, %v4471_v24  ;;  %v351_v50 = vrot.slane %v334_v43, %v4482_v44  ;;  %v3896_v43 = vld [vmem:[#allocation8 + $0x1ec] ss:$16 sps:$4 sm:$0xff]  }
 0x145   :  { %1571 = vmatpush1.bf16.msra.mxu1 %v3768_v51  ;;  %1612 = vmatpush1.bf16.msra.mxu0 %v3771_v52 }
 0x146   :  { %1572 = vmatprep.subr.bf16.mxu1 %v3776_v53  ;;  %1613 = vmatprep.subr.bf16.mxu0 %v3779_v54 }
 0x149   :  { %1573 = vmatpush1.bf16.msra.mxu1 %v3774_v55  ;;  %1614 = vmatpush1.bf16.msra.mxu0 %v3777_v56 }
 0x14a   :  { %1574 = vmatprep.subr.bf16.mxu1 %v3782_v57  ;;  %1615 = vmatprep.subr.bf16.mxu0 %v3785_v58 }
 0x14d   :  { %1575 = vmatpush1.bf16.msra.mxu1 %v3780_v59  ;;  %1616 = vmatpush1.bf16.msra.mxu0 %v3783_v60 }
 0x14e   :  { %1576 = vmatprep.subr.bf16.mxu1 %v3788_v61  ;;  %1617 = vmatprep.subr.bf16.mxu0 %v3791_v62 }
 0x151   :  { %1577 = vmatpush1.bf16.msra.mxu1 %v3786_v63  ;;  %1618 = vmatpush1.bf16.msra.mxu0 %v3789_v0 }
 0x152   :  { %1578 = vmatprep.subr.bf16.mxu1 %v3794_v1  ;;  %1619 = vmatprep.subr.bf16.mxu0 %v3797_v2 }
 0x155   :  { %1579 = vmatpush1.bf16.msra.mxu1 %v3792_v3  ;;  %1620 = vmatpush1.bf16.msra.mxu0 %v3795_v4 }
 0x156   :  { %1580 = vmatprep.subr.bf16.mxu1 %v3800_v5  ;;  %1621 = vmatprep.subr.bf16.mxu0 %v3803_v6  ;;  %v3846_v6 = vld [vmem:[#allocation8 + $0xe8] ss:$16 sps:$4 sm:$0xff]  }
 0x159   :  { %1581 = vmatpush2.bf16.msra.mxu1 %v3798_v7  ;;  %1622 = vmatpush2.bf16.msra.mxu0 %v3801_v8 }
 0x15a   :  { %1582 = vmatprep.subr.bf16.mxu1 %v3806_v9  ;;  %1623 = vmatprep.subr.bf16.mxu0 %v3809_v10  ;;  %v3849_v9 = vld [vmem:[#allocation8 + $0x2e8] ss:$16 sps:$4 sm:$0xff]  }
 0x15d   :  { %1583 = vmatpush2.bf16.msra.mxu1 %v3804_v11  ;;  %1624 = vmatpush2.bf16.msra.mxu0 %v3807_v12  ;;  %v3854_v11 = vld [vmem:[#allocation8 + $0xcc] ss:$16 sps:$4 sm:$0xff]  }
 0x15e   :  { %1584 = vmatprep.subr.bf16.mxu1 %v3812_v13  ;;  %1625 = vmatprep.subr.bf16.mxu0 %v3815_v14  ;;  %v3857_v12 = vld [vmem:[#allocation8 + $0x2cc] ss:$16 sps:$4 sm:$0xff]   ;;  %v3852_v13 = vld [vmem:[#allocation8 + $0xc8] ss:$16 sps:$4 sm:$0xff]  }
 0x15f   :  { %v3855_v14 = vld [vmem:[#allocation8 + $0x2c8] ss:$16 sps:$4 sm:$0xff]  }
 0x161   :  { %1585 = vmatpush2.bf16.msra.mxu1 %v3810_v15  ;;  %1626 = vmatpush2.bf16.msra.mxu0 %v3813_v16  ;;  %v3860_v15 = vld [vmem:[#allocation8 + $0xac] ss:$16 sps:$4 sm:$0xff]  }
 0x162   :  { %1586 = vmatprep.subr.bf16.mxu1 %v3818_v17  ;;  %1627 = vmatprep.subr.bf16.mxu0 %v3821_v18  ;;  %v3863_v16 = vld [vmem:[#allocation8 + $0x2ac] ss:$16 sps:$4 sm:$0xff]   ;;  %v3858_v17 = vld [vmem:[#allocation8 + $0xa8] ss:$16 sps:$4 sm:$0xff]  }
 0x163   :  { %v3861_v18 = vld [vmem:[#allocation8 + $0x2a8] ss:$16 sps:$4 sm:$0xff]  }
 0x165   :  { %1587 = vmatpush2.bf16.msra.mxu1 %v3816_v19  ;;  %1628 = vmatpush2.bf16.msra.mxu0 %v3819_v20  ;;  %v3866_v19 = vld [vmem:[#allocation8 + $0x8c] ss:$16 sps:$4 sm:$0xff]  }
 0x166   :  { %1588 = vmatprep.subr.bf16.mxu1 %v3824_v23  ;;  %1629 = vmatprep.subr.bf16.mxu0 %v3827_v25  ;;  %v3869_v20 = vld [vmem:[#allocation8 + $0x28c] ss:$16 sps:$4 sm:$0xff]   ;;  %v3864_v23 = vld [vmem:[#allocation8 + $0x88] ss:$16 sps:$4 sm:$0xff]  }
 0x167   :  { %v3867_v25 = vld [vmem:[#allocation8 + $0x288] ss:$16 sps:$4 sm:$0xff]  }
 0x169   :  { %1589 = vmatpush2.bf16.msra.mxu1 %v3822_v26  ;;  %1630 = vmatpush2.bf16.msra.mxu0 %v3825_v27  ;;  %v3872_v26 = vld [vmem:[#allocation8 + $0x6c] ss:$16 sps:$4 sm:$0xff]  }
 0x16a   :  { %1590 = vmatprep.subr.bf16.mxu1 %v3830_v28  ;;  %1631 = vmatprep.subr.bf16.mxu0 %v3833_v29  ;;  %v3875_v27 = vld [vmem:[#allocation8 + $0x26c] ss:$16 sps:$4 sm:$0xff]   ;;  %v3870_v28 = vld [vmem:[#allocation8 + $0x68] ss:$16 sps:$4 sm:$0xff]  }
 0x16b   :  { %v3873_v29 = vld [vmem:[#allocation8 + $0x268] ss:$16 sps:$4 sm:$0xff]  }
 0x16d   :  { %1591 = vmatpush2.bf16.msra.mxu1 %v3828_v30  ;;  %1632 = vmatpush2.bf16.msra.mxu0 %v3831_v31  ;;  %v3878_v30 = vld [vmem:[#allocation8 + $0x4c] ss:$16 sps:$4 sm:$0xff]  }
 0x16e   :  { %1592 = vmatprep.subr.bf16.mxu1 %v3836_v32  ;;  %1633 = vmatprep.subr.bf16.mxu0 %v3839_v33  ;;  %v3881_v31 = vld [vmem:[#allocation8 + $0x24c] ss:$16 sps:$4 sm:$0xff]   ;;  %v3876_v32 = vld [vmem:[#allocation8 + $0x48] ss:$16 sps:$4 sm:$0xff]  }
 0x16f   :  { %v3879_v33 = vld [vmem:[#allocation8 + $0x248] ss:$16 sps:$4 sm:$0xff]  }
 0x171   :  { %1593 = vmatpush2.bf16.msra.mxu1 %v3834_v34  ;;  %1634 = vmatpush2.bf16.msra.mxu0 %v3837_v35  ;;  %v3884_v34 = vld [vmem:[#allocation8 + $0x2c] ss:$16 sps:$4 sm:$0xff]  }
 0x172   :  { %1594 = vmatprep.subr.bf16.mxu1 %v3842_v36  ;;  %1635 = vmatprep.subr.bf16.mxu0 %v3845_v37  ;;  %v3887_v35 = vld [vmem:[#allocation8 + $0x22c] ss:$16 sps:$4 sm:$0xff]   ;;  %v3882_v36 = vld [vmem:[#allocation8 + $0x28] ss:$16 sps:$4 sm:$0xff]  }
 0x173   :  { %v3885_v37 = vld [vmem:[#allocation8 + $0x228] ss:$16 sps:$4 sm:$0xff]  }
 0x175   :  { %1595 = vmatpush2.bf16.msra.mxu1 %v3840_v38  ;;  %1636 = vmatpush2.bf16.msra.mxu0 %v3843_v39  ;;  %v3890_v38 = vld [vmem:[#allocation8 + $0xc] ss:$16 sps:$4 sm:$0xff]  }
 0x176   :  { %1646 = vmatprep.subr.bf16.mxu1 %v3848_v40  ;;  %1687 = vmatprep.subr.bf16.mxu0 %v3851_v41  ;;  %v3893_v39 = vld [vmem:[#allocation8 + $0x20c] ss:$16 sps:$4 sm:$0xff]   ;;  %v3888_v40 = vld [vmem:[#allocation8 + $0x8] ss:$16 sps:$4 sm:$0xff]  }
 0x177   :  { %v3891_v41 = vld [vmem:[#allocation8 + $0x208] ss:$16 sps:$4 sm:$0xff]  }
 0x1f8   :  { %v710_v47 = vpop.f32.mrf.mxu1  ;;  %v751_v48 = vpop.f32.mrf.mxu0 }
 0x1f9   :  { %v711_v51 = vadd.f32 %v710_v47, %v339_v45  ;;  %v752_v52 = vadd.f32 %v751_v48, %v347_v46  ;;  %v3899_v45 = vld [vmem:[#allocation8 + $0x3ec] ss:$16 sps:$4 sm:$0xff]   ;;  %v3894_v46 = vld [vmem:[#allocation8 + $0x1e8] ss:$16 sps:$4 sm:$0xff]  }
 0x1fa   :  { %v712_v53 = vpop.f32.mrf.mxu1  ;;  %v753_v54 = vpop.f32.mrf.mxu0  ;;  %v3897_v47 = vld [vmem:[#allocation8 + $0x3e8] ss:$16 sps:$4 sm:$0xff]   ;;  %v3902_v48 = vld [vmem:[#allocation8 + $0x1cc] ss:$16 sps:$4 sm:$0xff]  }
 0x1fb   :  { %v762_v55 = vmul.f32 0.01, %v711_v51  ;;  %vm758_vm2 = vcmp.gt.f32.partialorder %v711_v51, 0.0  ;;  %v764_v56 = vmul.f32 0.01, %v752_v52  ;;  %v713_v57 = vadd.f32 %v712_v53, %v343_v49 }
 0x1fc   :  { %v754_v58 = vadd.f32 %v753_v54, %v351_v50  ;;  %v714_v59 = vpop.f32.mrf.mxu1  ;;  %v755_v60 = vpop.f32.mrf.mxu0  ;;  %vm760_vm3 = vcmp.gt.f32.partialorder %v752_v52, 0.0  ;;  %v3905_v49 = vld [vmem:[#allocation8 + $0x3cc] ss:$16 sps:$4 sm:$0xff]   ;;  %v3900_v50 = vld [vmem:[#allocation8 + $0x1c8] ss:$16 sps:$4 sm:$0xff]  }
 0x1fd   :  { %vm759_vm4 = vcmp.gt.f32.partialorder %v713_v57, 0.0  ;;  %v763_v61 = vmul.f32 0.01, %v713_v57  ;;  %v766_v0 = vsel %vm758_vm2, %v711_v51, %v762_v55  ;;  %v768_v2 = vsel %vm760_vm3, %v752_v52, %v764_v56  ;;  %v3903_v51 = vld [vmem:[#allocation8 + $0x3c8] ss:$16 sps:$4 sm:$0xff]  }
 0x1fe   :  { %v715_v62 = vpop.f32.mrf.mxu1  ;;  %v756_v63 = vpop.f32.mrf.mxu0  ;;  %vm761_vm5 = vcmp.gt.f32.partialorder %v754_v58, 0.0  ;;  %v765_v1 = vmul.f32 0.01, %v754_v58  ;;  %v4488_v7 = vpack.c.bf16 %v766_v0, %v766_v0  ;;  %v4490_v10 = vpack.c.bf16 %v768_v2, %v768_v2  ;;  %v3908_v52 = vld [vmem:[#allocation8 + $0x1ac] ss:$16 sps:$4 sm:$0xff]  }
 0x1ff   :  { %v767_v3 = vsel %vm759_vm4, %v713_v57, %v763_v61  ;;  %v3911_v53 = vld [vmem:[#allocation8 + $0x3ac] ss:$16 sps:$4 sm:$0xff]   ;;  %v3906_v54 = vld [vmem:[#allocation8 + $0x1a8] ss:$16 sps:$4 sm:$0xff]  }
 0x200   :  { %v771_v4 = vpack.c.bf16 %v767_v3, %v767_v3  ;;  %v769_v5 = vsel %vm761_vm5, %v754_v58, %v765_v1  ;;  %v3909_v55 = vld [vmem:[#allocation8 + $0x3a8] ss:$16 sps:$4 sm:$0xff]   ;;  %v3914_v56 = vld [vmem:[#allocation8 + $0x18c] ss:$16 sps:$4 sm:$0xff]  }
 0x201   :  { %v773_v8 = vpack.c.bf16 %v769_v5, %v769_v5  ;;  %v3917_v57 = vld [vmem:[#allocation8 + $0x38c] ss:$16 sps:$4 sm:$0xff]   ;;  %v3912_v58 = vld [vmem:[#allocation8 + $0x188] ss:$16 sps:$4 sm:$0xff]  }
 0x202   :  { %1596 = vmatprep.mubr.bf16.mxu1 %v771_v4  ;;  %v3915_v59 = vld [vmem:[#allocation8 + $0x388] ss:$16 sps:$4 sm:$0xff]   ;;  %v3920_v60 = vld [vmem:[#allocation8 + $0x16c] ss:$16 sps:$4 sm:$0xff]  }
 0x203   :  { %1637 = vmatprep.mubr.bf16.mxu0 %v773_v8  ;;  %1597 = vmatmul.mubr.bf16.vlgmr.msra.gmra.mxu1 %v4488_v7  ;;  %v3923_v61 = vld [vmem:[#allocation8 + $0x36c] ss:$16 sps:$4 sm:$0xff]   ;;  %v3918_v62 = vld [vmem:[#allocation8 + $0x168] ss:$16 sps:$4 sm:$0xff]  }
 0x204   :  { %1638 = vmatmul.mubr.bf16.vlgmr.msra.gmra.mxu0 %v4490_v10  ;;  %1647 = vmatpush1.bf16.msra.mxu1 %v3846_v6  ;;  %v3921_v63 = vld [vmem:[#allocation8 + $0x368] ss:$16 sps:$4 sm:$0xff]   ;;  %v3926_v0 = vld [vmem:[#allocation8 + $0x14c] ss:$16 sps:$4 sm:$0xff]  }
 0x205   :  { %1688 = vmatpush1.bf16.msra.mxu0 %v3849_v9  ;;  %1678 = vmatprep.mubr.bf16.mxu1 %v771_v4  ;;  %v3929_v1 = vld [vmem:[#allocation8 + $0x34c] ss:$16 sps:$4 sm:$0xff]   ;;  %v3924_v2 = vld [vmem:[#allocation8 + $0x148] ss:$16 sps:$4 sm:$0xff]  }
 0x206   :  { %1719 = vmatprep.mubr.bf16.mxu0 %v773_v8  ;;  %1648 = vmatprep.subr.bf16.mxu1 %v3854_v11  ;;  %v3927_v3 = vld [vmem:[#allocation8 + $0x348] ss:$16 sps:$4 sm:$0xff]   ;;  %v3932_v4 = vld [vmem:[#allocation8 + $0x12c] ss:$16 sps:$4 sm:$0xff]  }
 0x207   :  { %1689 = vmatprep.subr.bf16.mxu0 %v3857_v12  ;;  %v3935_v5 = vld [vmem:[#allocation8 + $0x32c] ss:$16 sps:$4 sm:$0xff]   ;;  %v3930_v6 = vld [vmem:[#allocation8 + $0x128] ss:$16 sps:$4 sm:$0xff]  }
 0x208   :  { %1649 = vmatpush1.bf16.msra.mxu1 %v3852_v13  ;;  %v3933_v8 = vld [vmem:[#allocation8 + $0x328] ss:$16 sps:$4 sm:$0xff]   ;;  %v3938_v9 = vld [vmem:[#allocation8 + $0x10c] ss:$16 sps:$4 sm:$0xff]  }
 0x209   :  { %1690 = vmatpush1.bf16.msra.mxu0 %v3855_v14  ;;  %1650 = vmatprep.subr.bf16.mxu1 %v3860_v15  ;;  %v3941_v11 = vld [vmem:[#allocation8 + $0x30c] ss:$16 sps:$4 sm:$0xff]   ;;  %v3936_v12 = vld [vmem:[#allocation8 + $0x108] ss:$16 sps:$4 sm:$0xff]  }
 0x20a   :  { %1691 = vmatprep.subr.bf16.mxu0 %v3863_v16  ;;  %v3939_v13 = vld [vmem:[#allocation8 + $0x308] ss:$16 sps:$4 sm:$0xff]   ;;  %v3942_v15 = vld [vmem:[#allocation11 + $0x150] ss:$24 sps:$4 sm:$0xff]  }
 0x20b   :  { %v3944_v14 = vld [vmem:[#allocation11 + $0x154] ss:$24 sps:$4 sm:$0xff]   ;;  %v3947_v16 = vld [vmem:[#allocation11 + $0x124] ss:$24 sps:$4 sm:$0xff]  }
 0x20c   :  { %1651 = vmatpush1.bf16.msra.mxu1 %v3858_v17  ;;  %v3945_v17 = vld [vmem:[#allocation11 + $0x120] ss:$24 sps:$4 sm:$0xff]  }
 0x20d   :  { %1692 = vmatpush1.bf16.msra.mxu0 %v3861_v18  ;;  %1652 = vmatprep.subr.bf16.mxu1 %v3866_v19  ;;  %v3950_v18 = vld [vmem:[#allocation11 + $0xf4] ss:$24 sps:$4 sm:$0xff]   ;;  %v3948_v19 = vld [vmem:[#allocation11 + $0xf0] ss:$24 sps:$4 sm:$0xff]  }
 0x20e   :  { %1693 = vmatprep.subr.bf16.mxu0 %v3869_v20  ;;  %v3953_v20 = vld [vmem:[#allocation11 + $0xc4] ss:$24 sps:$4 sm:$0xff]  }
 0x210   :  { %1653 = vmatpush1.bf16.msra.mxu1 %v3864_v23  ;;  %v3990_v23 = vld [vmem:[#allocation11 + $0x450] ss:$24 sps:$4 sm:$0xff]  }
 0x211   :  { %1694 = vmatpush1.bf16.msra.mxu0 %v3867_v25  ;;  %1654 = vmatprep.subr.bf16.mxu1 %v3872_v26  ;;  %v3951_v25 = vld [vmem:[#allocation11 + $0xc0] ss:$24 sps:$4 sm:$0xff]   ;;  %v3992_v26 = vld [vmem:[#allocation11 + $0x454] ss:$24 sps:$4 sm:$0xff]  }
 0x212   :  { %1695 = vmatprep.subr.bf16.mxu0 %v3875_v27  ;;  %v3956_v27 = vld [vmem:[#allocation11 + $0x94] ss:$24 sps:$4 sm:$0xff]  }
 0x214   :  { %1655 = vmatpush1.bf16.msra.mxu1 %v3870_v28  ;;  %v3996_v28 = vld [vmem:[#allocation11 + $0x420] ss:$24 sps:$4 sm:$0xff]  }
 0x215   :  { %1696 = vmatpush1.bf16.msra.mxu0 %v3873_v29  ;;  %1656 = vmatprep.subr.bf16.mxu1 %v3878_v30  ;;  %v3998_v29 = vld [vmem:[#allocation11 + $0x424] ss:$24 sps:$4 sm:$0xff]   ;;  %v3957_v30 = vld [vmem:[#allocation11 + $0x60] ss:$24 sps:$4 sm:$0xff]  }
 0x216   :  { %1697 = vmatprep.subr.bf16.mxu0 %v3881_v31  ;;  %v3962_v31 = vld [vmem:[#allocation11 + $0x34] ss:$24 sps:$4 sm:$0xff]  }
 0x218   :  { %1657 = vmatpush1.bf16.msra.mxu1 %v3876_v32  ;;  %v4002_v32 = vld [vmem:[#allocation11 + $0x3f0] ss:$24 sps:$4 sm:$0xff]  }
 0x219   :  { %1698 = vmatpush1.bf16.msra.mxu0 %v3879_v33  ;;  %1658 = vmatprep.subr.bf16.mxu1 %v3884_v34  ;;  %v4004_v33 = vld [vmem:[#allocation11 + $0x3f4] ss:$24 sps:$4 sm:$0xff]   ;;  %v3960_v34 = vld [vmem:[#allocation11 + $0x30] ss:$24 sps:$4 sm:$0xff]  }
 0x21a   :  { %1699 = vmatprep.subr.bf16.mxu0 %v3887_v35  ;;  %v3965_v35 = vld [vmem:[#allocation11 + $0x4] ss:$24 sps:$4 sm:$0xff]  }
 0x21c   :  { %1659 = vmatpush1.bf16.msra.mxu1 %v3882_v36  ;;  %v4008_v36 = vld [vmem:[#allocation11 + $0x3c0] ss:$24 sps:$4 sm:$0xff]  }
 0x21d   :  { %1700 = vmatpush1.bf16.msra.mxu0 %v3885_v37  ;;  %1660 = vmatprep.subr.bf16.mxu1 %v3890_v38  ;;  %v4010_v37 = vld [vmem:[#allocation11 + $0x3c4] ss:$24 sps:$4 sm:$0xff]   ;;  %v3963_v38 = vld [vmem:[#allocation11] ss:$24 sps:$4 sm:$0xff]  }
 0x21e   :  { %1701 = vmatprep.subr.bf16.mxu0 %v3893_v39  ;;  %v3968_v39 = vld [vmem:[#allocation11 + $0x2d4] ss:$24 sps:$4 sm:$0xff]  }
 0x220   :  { %1661 = vmatpush1.bf16.msra.mxu1 %v3888_v40  ;;  %v4014_v40 = vld [vmem:[#allocation11 + $0x390] ss:$24 sps:$4 sm:$0xff]  }
 0x221   :  { %1702 = vmatpush1.bf16.msra.mxu0 %v3891_v41  ;;  %1662 = vmatprep.subr.bf16.mxu1 %v3896_v43  ;;  %v4016_v41 = vld [vmem:[#allocation11 + $0x394] ss:$24 sps:$4 sm:$0xff]   ;;  %v3966_v43 = vld [vmem:[#allocation11 + $0x2d0] ss:$24 sps:$4 sm:$0xff]  }
 0x222   :  { %1703 = vmatprep.subr.bf16.mxu0 %v3899_v45  ;;  %v3971_v45 = vld [vmem:[#allocation11 + $0x2a4] ss:$24 sps:$4 sm:$0xff]  }
 0x224   :  { %1663 = vmatpush2.bf16.msra.mxu1 %v3894_v46  ;;  %v4020_v46 = vld [vmem:[#allocation11 + $0x360] ss:$24 sps:$4 sm:$0xff]  }
 0x225   :  { %1704 = vmatpush2.bf16.msra.mxu0 %v3897_v47  ;;  %1664 = vmatprep.subr.bf16.mxu1 %v3902_v48  ;;  %v4022_v47 = vld [vmem:[#allocation11 + $0x364] ss:$24 sps:$4 sm:$0xff]   ;;  %v3969_v48 = vld [vmem:[#allocation11 + $0x2a0] ss:$24 sps:$4 sm:$0xff]  }
 0x226   :  { %1705 = vmatprep.subr.bf16.mxu0 %v3905_v49  ;;  %v3974_v49 = vld [vmem:[#allocation11 + $0x274] ss:$24 sps:$4 sm:$0xff]  }
 0x228   :  { %1665 = vmatpush2.bf16.msra.mxu1 %v3900_v50  ;;  %v4026_v50 = vld [vmem:[#allocation11 + $0x330] ss:$24 sps:$4 sm:$0xff]  }
 0x229   :  { %1706 = vmatpush2.bf16.msra.mxu0 %v3903_v51  ;;  %1666 = vmatprep.subr.bf16.mxu1 %v3908_v52  ;;  %v4028_v51 = vld [vmem:[#allocation11 + $0x334] ss:$24 sps:$4 sm:$0xff]   ;;  %v3972_v52 = vld [vmem:[#allocation11 + $0x270] ss:$24 sps:$4 sm:$0xff]  }
 0x22a   :  { %1707 = vmatprep.subr.bf16.mxu0 %v3911_v53  ;;  %v3977_v53 = vld [vmem:[#allocation11 + $0x244] ss:$24 sps:$4 sm:$0xff]  }
 0x22c   :  { %1667 = vmatpush2.bf16.msra.mxu1 %v3906_v54  ;;  %v4032_v54 = vld [vmem:[#allocation11 + $0x300] ss:$24 sps:$4 sm:$0xff]  }
 0x22d   :  { %1708 = vmatpush2.bf16.msra.mxu0 %v3909_v55  ;;  %1668 = vmatprep.subr.bf16.mxu1 %v3914_v56  ;;  %v4034_v55 = vld [vmem:[#allocation11 + $0x304] ss:$24 sps:$4 sm:$0xff]   ;;  %v3975_v56 = vld [vmem:[#allocation11 + $0x240] ss:$24 sps:$4 sm:$0xff]  }
 0x22e   :  { %1709 = vmatprep.subr.bf16.mxu0 %v3917_v57  ;;  %v3980_v57 = vld [vmem:[#allocation11 + $0x214] ss:$24 sps:$4 sm:$0xff]  }
 0x230   :  { %1669 = vmatpush2.bf16.msra.mxu1 %v3912_v58  ;;  %v4038_v58 = vld [vmem:[#allocation11 + $0x5d0] ss:$24 sps:$4 sm:$0xff]  }
 0x231   :  { %1710 = vmatpush2.bf16.msra.mxu0 %v3915_v59  ;;  %1670 = vmatprep.subr.bf16.mxu1 %v3920_v60  ;;  %v4040_v59 = vld [vmem:[#allocation11 + $0x5d4] ss:$24 sps:$4 sm:$0xff]   ;;  %v3978_v60 = vld [vmem:[#allocation11 + $0x210] ss:$24 sps:$4 sm:$0xff]  }
 0x232   :  { %1711 = vmatprep.subr.bf16.mxu0 %v3923_v61  ;;  %v3983_v61 = vld [vmem:[#allocation11 + $0x1e4] ss:$24 sps:$4 sm:$0xff]  }
 0x234   :  { %1671 = vmatpush2.bf16.msra.mxu1 %v3918_v62  ;;  %v4044_v62 = vld [vmem:[#allocation11 + $0x5a0] ss:$24 sps:$4 sm:$0xff]  }
 0x235   :  { %1712 = vmatpush2.bf16.msra.mxu0 %v3921_v63  ;;  %1672 = vmatprep.subr.bf16.mxu1 %v3926_v0  ;;  %v4046_v63 = vld [vmem:[#allocation11 + $0x5a4] ss:$24 sps:$4 sm:$0xff]   ;;  %v3981_v0 = vld [vmem:[#allocation11 + $0x1e0] ss:$24 sps:$4 sm:$0xff]  }
 0x236   :  { %1713 = vmatprep.subr.bf16.mxu0 %v3929_v1  ;;  %v3986_v1 = vld [vmem:[#allocation11 + $0x1b4] ss:$24 sps:$4 sm:$0xff]  }
 0x238   :  { %1673 = vmatpush2.bf16.msra.mxu1 %v3924_v2  ;;  %v4050_v2 = vld [vmem:[#allocation11 + $0x570] ss:$24 sps:$4 sm:$0xff]  }
 0x239   :  { %1714 = vmatpush2.bf16.msra.mxu0 %v3927_v3  ;;  %1674 = vmatprep.subr.bf16.mxu1 %v3932_v4  ;;  %v4052_v3 = vld [vmem:[#allocation11 + $0x574] ss:$24 sps:$4 sm:$0xff]   ;;  %v3984_v4 = vld [vmem:[#allocation11 + $0x1b0] ss:$24 sps:$4 sm:$0xff]  }
 0x23a   :  { %1715 = vmatprep.subr.bf16.mxu0 %v3935_v5  ;;  %v3989_v5 = vld [vmem:[#allocation11 + $0x184] ss:$24 sps:$4 sm:$0xff]  }
 0x23c   :  { %1675 = vmatpush2.bf16.msra.mxu1 %v3930_v6  ;;  %v4056_v6 = vld [vmem:[#allocation11 + $0x540] ss:$24 sps:$4 sm:$0xff]  }
 0x23d   :  { %1716 = vmatpush2.bf16.msra.mxu0 %v3933_v8  ;;  %1676 = vmatprep.subr.bf16.mxu1 %v3938_v9  ;;  %v4058_v8 = vld [vmem:[#allocation11 + $0x544] ss:$24 sps:$4 sm:$0xff]   ;;  %v3987_v9 = vld [vmem:[#allocation11 + $0x180] ss:$24 sps:$4 sm:$0xff]  }
 0x23e   :  { %1717 = vmatprep.subr.bf16.mxu0 %v3941_v11  ;;  %v3995_v11 = vld [vmem:[#allocation11 + $0x15c] ss:$24 sps:$4 sm:$0xff]  }
 0x240   :  { %1677 = vmatpush2.bf16.msra.mxu1 %v3936_v12  ;;  %v4062_v12 = vld [vmem:[#allocation11 + $0x510] ss:$24 sps:$4 sm:$0xff]  }
 0x241   :  { %1718 = vmatpush2.bf16.msra.mxu0 %v3939_v13  ;;  %2928 = vmatprep.subr.bf16.mxu1 %v3944_v14  ;;  %v4064_v13 = vld [vmem:[#allocation11 + $0x514] ss:$24 sps:$4 sm:$0xff]   ;;  %v4070_v14 = vld [vmem:[#allocation11 + $0x4e4] ss:$24 sps:$4 sm:$0xff]  }
 0x242   :  { %2969 = vmatprep.subr.bf16.mxu0 %v3992_v26 }
 0x243   :  { %1679 = vmatmul.mubr.bf16.vlgmr.msra.gmra.mxu1 %v4488_v7  ;;  %v3954_v7 = vld [vmem:[#allocation11 + $0x90] ss:$24 sps:$4 sm:$0xff]  }
 0x244   :  { %1720 = vmatmul.mubr.bf16.vlgmr.msra.gmra.mxu0 %v4490_v10  ;;  %2929 = vmatpush1.bf16.msra.mxu1 %v3942_v15  ;;  %v3959_v10 = vld [vmem:[#allocation11 + $0x64] ss:$24 sps:$4 sm:$0xff]   ;;  %v4068_v15 = vld [vmem:[#allocation11 + $0x4e0] ss:$24 sps:$4 sm:$0xff]  }
 0x245   :  { %2930 = vmatprep.subr.bf16.mxu1 %v3947_v16  ;;  %2970 = vmatpush1.bf16.msra.mxu0 %v3990_v23  ;;  %v4076_v16 = vld [vmem:[#allocation11 + $0x4b4] ss:$24 sps:$4 sm:$0xff]   ;;  %v4496_v23 = vld [vmem:[#allocation10] sm:$0xf] }
 0x246   :  { %2971 = vmatprep.subr.bf16.mxu0 %v3998_v29  ;;  %v911_v26 = vrot.slane %v4496_v23, %v4471_v24 }
 0x248   :  { %2931 = vmatpush1.bf16.msra.mxu1 %v3945_v17  ;;  %v4074_v17 = vld [vmem:[#allocation11 + $0x4b0] ss:$24 sps:$4 sm:$0xff]  }
 0x249   :  { %2932 = vmatprep.subr.bf16.mxu1 %v3950_v18  ;;  %2972 = vmatpush1.bf16.msra.mxu0 %v3996_v28  ;;  %v4082_v18 = vld [vmem:[#allocation11 + $0x484] ss:$24 sps:$4 sm:$0xff]  }
 0x24a   :  { %2973 = vmatprep.subr.bf16.mxu0 %v4004_v33 }
 0x24c   :  { %2933 = vmatpush1.bf16.msra.mxu1 %v3948_v19  ;;  %v4080_v19 = vld [vmem:[#allocation11 + $0x480] ss:$24 sps:$4 sm:$0xff]  }
 0x24d   :  { %2934 = vmatprep.subr.bf16.mxu1 %v3953_v20  ;;  %2974 = vmatpush1.bf16.msra.mxu0 %v4002_v32  ;;  %v4088_v20 = vld [vmem:[#allocation11 + $0x45c] ss:$24 sps:$4 sm:$0xff]  }
 0x24e   :  { %2975 = vmatprep.subr.bf16.mxu0 %v4010_v37 }
 0x250   :  { %2935 = vmatpush1.bf16.msra.mxu1 %v3951_v25  ;;  %v907_v25 = vrot.slane %v4496_v23, %v4465_v22 }
 0x251   :  { %2936 = vmatprep.subr.bf16.mxu1 %v3956_v27  ;;  %2976 = vmatpush1.bf16.msra.mxu0 %v4008_v36 }
 0x252   :  { %2977 = vmatprep.subr.bf16.mxu0 %v4016_v41 }
 0x254   :  { %2937 = vmatpush1.bf16.msra.mxu1 %v3954_v7 }
 0x255   :  { %2938 = vmatprep.subr.bf16.mxu1 %v3959_v10  ;;  %2978 = vmatpush1.bf16.msra.mxu0 %v4014_v40 }
 0x256   :  { %2979 = vmatprep.subr.bf16.mxu0 %v4022_v47  ;;  %v3999_v47 = vld [vmem:[#allocation11 + $0x128] ss:$24 sps:$4 sm:$0xff]  }
 0x258   :  { %2939 = vmatpush1.bf16.msra.mxu1 %v3957_v30 }
 0x259   :  { %2940 = vmatprep.subr.bf16.mxu1 %v3962_v31  ;;  %2980 = vmatpush1.bf16.msra.mxu0 %v4020_v46  ;;  %v4001_v46 = vld [vmem:[#allocation11 + $0x12c] ss:$24 sps:$4 sm:$0xff]  }
 0x25a   :  { %2981 = vmatprep.subr.bf16.mxu0 %v4028_v51  ;;  %v4011_v51 = vld [vmem:[#allocation11 + $0xc8] ss:$24 sps:$4 sm:$0xff]  }
 0x25c   :  { %2941 = vmatpush1.bf16.msra.mxu1 %v3960_v34 }
 0x25d   :  { %2942 = vmatprep.subr.bf16.mxu1 %v3965_v35  ;;  %2982 = vmatpush1.bf16.msra.mxu0 %v4026_v50  ;;  %v4013_v50 = vld [vmem:[#allocation11 + $0xcc] ss:$24 sps:$4 sm:$0xff]  }
 0x25e   :  { %2983 = vmatprep.subr.bf16.mxu0 %v4034_v55  ;;  %v4023_v55 = vld [vmem:[#allocation11 + $0x68] ss:$24 sps:$4 sm:$0xff]  }
 0x260   :  { %2943 = vmatpush1.bf16.msra.mxu1 %v3963_v38 }
 0x261   :  { %2944 = vmatprep.subr.bf16.mxu1 %v3968_v39  ;;  %2984 = vmatpush1.bf16.msra.mxu0 %v4032_v54  ;;  %v4025_v54 = vld [vmem:[#allocation11 + $0x6c] ss:$24 sps:$4 sm:$0xff]  }
 0x262   :  { %2985 = vmatprep.subr.bf16.mxu0 %v4040_v59  ;;  %v4035_v59 = vld [vmem:[#allocation11 + $0x8] ss:$24 sps:$4 sm:$0xff]  }
 0x264   :  { %2945 = vmatpush2.bf16.msra.mxu1 %v3966_v43  ;;  %v3993_v43 = vld [vmem:[#allocation11 + $0x158] ss:$24 sps:$4 sm:$0xff]  }
 0x265   :  { %2946 = vmatprep.subr.bf16.mxu1 %v3971_v45  ;;  %2986 = vmatpush2.bf16.msra.mxu0 %v4038_v58  ;;  %v4037_v58 = vld [vmem:[#allocation11 + $0xc] ss:$24 sps:$4 sm:$0xff]  }
 0x266   :  { %2987 = vmatprep.subr.bf16.mxu0 %v4046_v63  ;;  %v4047_v63 = vld [vmem:[#allocation11 + $0x2a8] ss:$24 sps:$4 sm:$0xff]  }
 0x268   :  { %2947 = vmatpush2.bf16.msra.mxu1 %v3969_v48  ;;  %v4007_v48 = vld [vmem:[#allocation11 + $0xfc] ss:$24 sps:$4 sm:$0xff]  }
 0x269   :  { %2948 = vmatprep.subr.bf16.mxu1 %v3974_v49  ;;  %2988 = vmatpush2.bf16.msra.mxu0 %v4044_v62  ;;  %v4005_v49 = vld [vmem:[#allocation11 + $0xf8] ss:$24 sps:$4 sm:$0xff]   ;;  %v4049_v62 = vld [vmem:[#allocation11 + $0x2ac] ss:$24 sps:$4 sm:$0xff]  }
 0x26a   :  { %2989 = vmatprep.subr.bf16.mxu0 %v4052_v3  ;;  %v4059_v3 = vld [vmem:[#allocation11 + $0x248] ss:$24 sps:$4 sm:$0xff]  }
 0x26c   :  { %2949 = vmatpush2.bf16.msra.mxu1 %v3972_v52  ;;  %v4019_v52 = vld [vmem:[#allocation11 + $0x9c] ss:$24 sps:$4 sm:$0xff]  }
 0x26d   :  { %2950 = vmatprep.subr.bf16.mxu1 %v3977_v53  ;;  %2990 = vmatpush2.bf16.msra.mxu0 %v4050_v2  ;;  %v4017_v53 = vld [vmem:[#allocation11 + $0x98] ss:$24 sps:$4 sm:$0xff]   ;;  %v4061_v2 = vld [vmem:[#allocation11 + $0x24c] ss:$24 sps:$4 sm:$0xff]  }
 0x26e   :  { %2991 = vmatprep.subr.bf16.mxu0 %v4058_v8  ;;  %v915_v8 = vrot.slane %v4496_v23, %v4476_v42 }
 0x270   :  { %2951 = vmatpush2.bf16.msra.mxu1 %v3975_v56  ;;  %v4031_v56 = vld [vmem:[#allocation11 + $0x3c] ss:$24 sps:$4 sm:$0xff]  }
 0x271   :  { %2952 = vmatprep.subr.bf16.mxu1 %v3980_v57  ;;  %2992 = vmatpush2.bf16.msra.mxu0 %v4056_v6  ;;  %v4029_v57 = vld [vmem:[#allocation11 + $0x38] ss:$24 sps:$4 sm:$0xff]   ;;  %v4073_v6 = vld [vmem:[#allocation11 + $0x1ec] ss:$24 sps:$4 sm:$0xff]  }
 0x272   :  { %2993 = vmatprep.subr.bf16.mxu0 %v4064_v13 }
 0x274   :  { %2953 = vmatpush2.bf16.msra.mxu1 %v3978_v60  ;;  %v4043_v60 = vld [vmem:[#allocation11 + $0x2dc] ss:$24 sps:$4 sm:$0xff]  }
 0x275   :  { %2954 = vmatprep.subr.bf16.mxu1 %v3983_v61  ;;  %2994 = vmatpush2.bf16.msra.mxu0 %v4062_v12  ;;  %v4041_v61 = vld [vmem:[#allocation11 + $0x2d8] ss:$24 sps:$4 sm:$0xff]   ;;  %v4079_v12 = vld [vmem:[#allocation11 + $0x1bc] ss:$24 sps:$4 sm:$0xff]  }
 0x276   :  { %2995 = vmatprep.subr.bf16.mxu0 %v4070_v14 }
 0x278   :  { %2955 = vmatpush2.bf16.msra.mxu1 %v3981_v0  ;;  %v4055_v0 = vld [vmem:[#allocation11 + $0x27c] ss:$24 sps:$4 sm:$0xff]  }
 0x279   :  { %2956 = vmatprep.subr.bf16.mxu1 %v3986_v1  ;;  %2996 = vmatpush2.bf16.msra.mxu0 %v4068_v15  ;;  %v4053_v1 = vld [vmem:[#allocation11 + $0x278] ss:$24 sps:$4 sm:$0xff]  }
 0x27a   :  { %2997 = vmatprep.subr.bf16.mxu0 %v4076_v16 }
 0x27c   :  { %2957 = vmatpush2.bf16.msra.mxu1 %v3984_v4  ;;  %v4067_v4 = vld [vmem:[#allocation11 + $0x21c] ss:$24 sps:$4 sm:$0xff]  }
 0x27d   :  { %2958 = vmatprep.subr.bf16.mxu1 %v3989_v5  ;;  %2998 = vmatpush2.bf16.msra.mxu0 %v4074_v17  ;;  %v4065_v5 = vld [vmem:[#allocation11 + $0x218] ss:$24 sps:$4 sm:$0xff]  }
 0x27e   :  { %2999 = vmatprep.subr.bf16.mxu0 %v4082_v18  ;;  %v4077_v17 = vld [vmem:[#allocation11 + $0x1b8] ss:$24 sps:$4 sm:$0xff]  }
 0x280   :  { %2959 = vmatpush2.bf16.msra.mxu1 %v3987_v9  ;;  %v4071_v9 = vld [vmem:[#allocation11 + $0x1e8] ss:$24 sps:$4 sm:$0xff]  }
 0x281   :  { %3010 = vmatprep.subr.bf16.mxu1 %v3995_v11  ;;  %3000 = vmatpush2.bf16.msra.mxu0 %v4080_v19  ;;  %v919_v11 = vrot.slane %v4496_v23, %v4482_v44  ;;  %v4083_v23 = vld [vmem:[#allocation11 + $0x188] ss:$24 sps:$4 sm:$0xff]  }
 0x282   :  { %3051 = vmatprep.subr.bf16.mxu0 %v4088_v20 }
 0x2c3   :  { %v1598_v27 = vpop.f32.mrf.mxu1 }
 0x2c4   :  { %v1599_v7 = vadd.f32 %v1598_v27, %v907_v25  ;;  %v1639_v10 = vpop.f32.mrf.mxu0  ;;  %v4085_v25 = vld [vmem:[#allocation11 + $0x18c] ss:$24 sps:$4 sm:$0xff]  }
 0x2c5   :  { %v1600_v28 = vpop.f32.mrf.mxu1 }
 0x2c6   :  { %v1640_v29 = vadd.f32 %v1639_v10, %v1599_v7  ;;  %v1601_v30 = vadd.f32 %v1600_v28, %v911_v26  ;;  %v1641_v31 = vpop.f32.mrf.mxu0 }
 0x2c7   :  { %v1602_v32 = vpop.f32.mrf.mxu1 }
 0x2c8   :  { %vm1728_vm6 = vcmp.gt.f32.partialorder %v1640_v29, 0.0  ;;  %v1732_v33 = vmul.f32 0.01, %v1640_v29  ;;  %v1642_v34 = vadd.f32 %v1641_v31, %v1601_v30  ;;  %v1643_v35 = vpop.f32.mrf.mxu0  ;;  %v4091_v31 = vld [vmem:[#allocation11 + $0x164] ss:$24 sps:$4 sm:$0xff]  }
 0x2c9   :  { %v1603_v36 = vpop.f32.mrf.mxu1  ;;  %v4086_v35 = vld [vmem:[#allocation11 + $0x458] ss:$24 sps:$4 sm:$0xff]  }
 0x2ca   :  { %vm1729_vm7 = vcmp.gt.f32.partialorder %v1642_v34, 0.0  ;;  %v1733_v37 = vmul.f32 0.01, %v1642_v34  ;;  %v1644_v38 = vpop.f32.mrf.mxu0  ;;  %v1736_v39 = vsel %vm1728_vm6, %v1640_v29, %v1732_v33 }
 0x2cb   :  { %v4504_v45 = vpack.c.bf16 %v1736_v39, %v1736_v39  ;;  %v4094_v38 = vld [vmem:[#allocation11 + $0x42c] ss:$24 sps:$4 sm:$0xff]  }
 0x2cc   :  { %v1737_v40 = vsel %vm1729_vm7, %v1642_v34, %v1733_v37  ;;  %v4089_v37 = vld [vmem:[#allocation11 + $0x160] ss:$24 sps:$4 sm:$0xff]   ;;  %v4097_v39 = vld [vmem:[#allocation11 + $0x134] ss:$24 sps:$4 sm:$0xff]  }
 0x2cd   :  { %v4502_v41 = vpack.c.bf16 %v1737_v40, %v1737_v40  ;;  %v4092_v40 = vld [vmem:[#allocation11 + $0x428] ss:$24 sps:$4 sm:$0xff]  }
 0x2cf   :  { %2960 = vmatprep.mubr.bf16.mxu1 %v4502_v41 }
 0x2d0   :  { %2961 = vmatmul.mubr.bf16.vlgmr.msra.gmra.mxu1 %v4504_v45 }
 0x2d1   :  { %3011 = vmatpush1.bf16.msra.mxu1 %v3993_v43  ;;  %3042 = vmatprep.mubr.bf16.mxu1 %v4502_v41  ;;  %v4095_v43 = vld [vmem:[#allocation11 + $0x130] ss:$24 sps:$4 sm:$0xff]  }
 0x2d2   :  { %3012 = vmatprep.subr.bf16.mxu1 %v4001_v46  ;;  %v4100_v46 = vld [vmem:[#allocation11 + $0x3fc] ss:$24 sps:$4 sm:$0xff]  }
 0x2d5   :  { %3013 = vmatpush1.bf16.msra.mxu1 %v3999_v47  ;;  %v4103_v47 = vld [vmem:[#allocation11 + $0x104] ss:$24 sps:$4 sm:$0xff]  }
 0x2d6   :  { %3014 = vmatprep.subr.bf16.mxu1 %v4007_v48  ;;  %v4098_v48 = vld [vmem:[#allocation11 + $0x3f8] ss:$24 sps:$4 sm:$0xff]  }
 0x2d9   :  { %3015 = vmatpush1.bf16.msra.mxu1 %v4005_v49  ;;  %v4101_v49 = vld [vmem:[#allocation11 + $0x100] ss:$24 sps:$4 sm:$0xff]  }
 0x2da   :  { %3016 = vmatprep.subr.bf16.mxu1 %v4013_v50  ;;  %v4106_v50 = vld [vmem:[#allocation11 + $0x3cc] ss:$24 sps:$4 sm:$0xff]  }
 0x2dd   :  { %3017 = vmatpush1.bf16.msra.mxu1 %v4011_v51  ;;  %v4109_v51 = vld [vmem:[#allocation11 + $0xd4] ss:$24 sps:$4 sm:$0xff]  }
 0x2de   :  { %3018 = vmatprep.subr.bf16.mxu1 %v4019_v52  ;;  %v4104_v52 = vld [vmem:[#allocation11 + $0x3c8] ss:$24 sps:$4 sm:$0xff]  }
 0x2e1   :  { %3019 = vmatpush1.bf16.msra.mxu1 %v4017_v53  ;;  %v4107_v53 = vld [vmem:[#allocation11 + $0xd0] ss:$24 sps:$4 sm:$0xff]  }
 0x2e2   :  { %3020 = vmatprep.subr.bf16.mxu1 %v4025_v54  ;;  %v4112_v54 = vld [vmem:[#allocation11 + $0x39c] ss:$24 sps:$4 sm:$0xff]  }
 0x2e5   :  { %3021 = vmatpush1.bf16.msra.mxu1 %v4023_v55  ;;  %v4110_v55 = vld [vmem:[#allocation11 + $0x398] ss:$24 sps:$4 sm:$0xff]  }
 0x2e6   :  { %3022 = vmatprep.subr.bf16.mxu1 %v4031_v56  ;;  %v4113_v56 = vld [vmem:[#allocation11 + $0xa0] ss:$24 sps:$4 sm:$0xff]  }
 0x2e9   :  { %3023 = vmatpush1.bf16.msra.mxu1 %v4029_v57  ;;  %v4118_v57 = vld [vmem:[#allocation11 + $0x36c] ss:$24 sps:$4 sm:$0xff]  }
 0x2ea   :  { %3024 = vmatprep.subr.bf16.mxu1 %v4037_v58  ;;  %v4121_v58 = vld [vmem:[#allocation11 + $0x74] ss:$24 sps:$4 sm:$0xff]  }
 0x2ed   :  { %3025 = vmatpush1.bf16.msra.mxu1 %v4035_v59  ;;  %v4116_v59 = vld [vmem:[#allocation11 + $0x368] ss:$24 sps:$4 sm:$0xff]  }
 0x2ee   :  { %3026 = vmatprep.subr.bf16.mxu1 %v4043_v60  ;;  %v4119_v60 = vld [vmem:[#allocation11 + $0x70] ss:$24 sps:$4 sm:$0xff]  }
 0x2f1   :  { %3027 = vmatpush2.bf16.msra.mxu1 %v4041_v61  ;;  %v4124_v61 = vld [vmem:[#allocation11 + $0x33c] ss:$24 sps:$4 sm:$0xff]  }
 0x2f2   :  { %3028 = vmatprep.subr.bf16.mxu1 %v4049_v62  ;;  %v4127_v62 = vld [vmem:[#allocation11 + $0x44] ss:$24 sps:$4 sm:$0xff]  }
 0x2f5   :  { %3029 = vmatpush2.bf16.msra.mxu1 %v4047_v63  ;;  %v4122_v63 = vld [vmem:[#allocation11 + $0x338] ss:$24 sps:$4 sm:$0xff]  }
 0x2f6   :  { %3030 = vmatprep.subr.bf16.mxu1 %v4055_v0  ;;  %v4125_v0 = vld [vmem:[#allocation11 + $0x40] ss:$24 sps:$4 sm:$0xff]  }
 0x2f9   :  { %3031 = vmatpush2.bf16.msra.mxu1 %v4053_v1  ;;  %v4130_v1 = vld [vmem:[#allocation11 + $0x30c] ss:$24 sps:$4 sm:$0xff]  }
 0x2fa   :  { %3032 = vmatprep.subr.bf16.mxu1 %v4061_v2  ;;  %v4133_v2 = vld [vmem:[#allocation11 + $0x14] ss:$24 sps:$4 sm:$0xff]  }
 0x2fd   :  { %3033 = vmatpush2.bf16.msra.mxu1 %v4059_v3  ;;  %v4128_v3 = vld [vmem:[#allocation11 + $0x308] ss:$24 sps:$4 sm:$0xff]  }
 0x2fe   :  { %3034 = vmatprep.subr.bf16.mxu1 %v4067_v4  ;;  %v4131_v4 = vld [vmem:[#allocation11 + $0x10] ss:$24 sps:$4 sm:$0xff]  }
 0x301   :  { %3035 = vmatpush2.bf16.msra.mxu1 %v4065_v5  ;;  %v4136_v5 = vld [vmem:[#allocation11 + $0x5dc] ss:$24 sps:$4 sm:$0xff]  }
 0x302   :  { %3036 = vmatprep.subr.bf16.mxu1 %v4073_v6  ;;  %v4139_v6 = vld [vmem:[#allocation11 + $0x2e4] ss:$24 sps:$4 sm:$0xff]  }
 0x303   :  { %v1680_v13 = vpop.f32.mrf.mxu1 }
 0x304   :  { %v1681_v14 = vadd.f32 %v1680_v13, %v915_v8  ;;  %v1721_v15 = vpop.f32.mrf.mxu0  ;;  %v4134_v8 = vld [vmem:[#allocation11 + $0x5d8] ss:$24 sps:$4 sm:$0xff]   ;;  %v4140_v13 = vld [vmem:[#allocation11 + $0x5a8] ss:$24 sps:$4 sm:$0xff]  }
 0x305   :  { %v1682_v16 = vpop.f32.mrf.mxu1  ;;  %3037 = vmatpush2.bf16.msra.mxu1 %v4071_v9  ;;  %v4137_v9 = vld [vmem:[#allocation11 + $0x2e0] ss:$24 sps:$4 sm:$0xff]  }
 0x306   :  { %v1722_v18 = vadd.f32 %v1721_v15, %v1681_v14  ;;  %v1683_v19 = vadd.f32 %v1682_v16, %v919_v11  ;;  %v1723_v20 = vpop.f32.mrf.mxu0  ;;  %3038 = vmatprep.subr.bf16.mxu1 %v4079_v12  ;;  %v4142_v11 = vld [vmem:[#allocation11 + $0x5ac] ss:$24 sps:$4 sm:$0xff]   ;;  %v4143_v14 = vld [vmem:[#allocation11 + $0x2b0] ss:$24 sps:$4 sm:$0xff]   ;;  %v4148_v15 = vld [vmem:[#allocation11 + $0x57c] ss:$24 sps:$4 sm:$0xff]  }
 0x307   :  { %v1684_v26 = vpop.f32.mrf.mxu1  ;;  %v4145_v12 = vld [vmem:[#allocation11 + $0x2b4] ss:$24 sps:$4 sm:$0xff]   ;;  %v4151_v16 = vld [vmem:[#allocation11 + $0x284] ss:$24 sps:$4 sm:$0xff]  }
 0x308   :  { %vm1730_vm8 = vcmp.gt.f32.partialorder %v1722_v18, 0.0  ;;  %v1734_v27 = vmul.f32 0.01, %v1722_v18  ;;  %v1724_v7 = vadd.f32 %v1723_v20, %v1683_v19  ;;  %v1725_v10 = vpop.f32.mrf.mxu0  ;;  %v4154_v19 = vld [vmem:[#allocation11 + $0x54c] ss:$24 sps:$4 sm:$0xff]  }
 0x309   :  { %v1685_v28 = vpop.f32.mrf.mxu1  ;;  %3039 = vmatpush2.bf16.msra.mxu1 %v4077_v17  ;;  %v4146_v17 = vld [vmem:[#allocation11 + $0x578] ss:$24 sps:$4 sm:$0xff]   ;;  %v4157_v20 = vld [vmem:[#allocation11 + $0x254] ss:$24 sps:$4 sm:$0xff]  }
 0x30a   :  { %vm1731_vm9 = vcmp.gt.f32.partialorder %v1724_v7, 0.0  ;;  %v1735_v29 = vmul.f32 0.01, %v1724_v7  ;;  %v1726_v30 = vpop.f32.mrf.mxu0  ;;  %3040 = vmatprep.subr.bf16.mxu1 %v4085_v25  ;;  %v1738_v32 = vsel %vm1730_vm8, %v1722_v18, %v1734_v27  ;;  %v4149_v18 = vld [vmem:[#allocation11 + $0x280] ss:$24 sps:$4 sm:$0xff]  }
 0x30b   :  { %v4515_v36 = vpack.c.bf16 %v1738_v32, %v1738_v32  ;;  %v4152_v25 = vld [vmem:[#allocation11 + $0x548] ss:$24 sps:$4 sm:$0xff]   ;;  %v4160_v27 = vld [vmem:[#allocation11 + $0x51c] ss:$24 sps:$4 sm:$0xff]   ;;  %v4158_v10 = vld [vmem:[#allocation11 + $0x518] ss:$24 sps:$4 sm:$0xff]  }
 0x30c   :  { %v1739_v33 = vsel %vm1731_vm9, %v1724_v7, %v1735_v29  ;;  %v4155_v26 = vld [vmem:[#allocation11 + $0x250] ss:$24 sps:$4 sm:$0xff]   ;;  %v4163_v7 = vld [vmem:[#allocation11 + $0x224] ss:$24 sps:$4 sm:$0xff]   ;;  %v4161_v28 = vld [vmem:[#allocation11 + $0x220] ss:$24 sps:$4 sm:$0xff]  }
 0x30d   :  { %3041 = vmatpush2.bf16.msra.mxu1 %v4083_v23  ;;  %v4513_v34 = vpack.c.bf16 %v1739_v33, %v1739_v33  ;;  %v4166_v23 = vld [vmem:[#allocation11 + $0x4ec] ss:$24 sps:$4 sm:$0xff]   ;;  %v4164_v30 = vld [vmem:[#allocation11 + $0x4e8] ss:$24 sps:$4 sm:$0xff]   ;;  %v4172_v32 = vld [vmem:[#allocation11 + $0x4bc] ss:$24 sps:$4 sm:$0xff]  }
 0x30e   :  { %3092 = vmatprep.subr.bf16.mxu1 %v4091_v31  ;;  %v4169_v29 = vld [vmem:[#allocation11 + $0x1f4] ss:$24 sps:$4 sm:$0xff]   ;;  %v4167_v31 = vld [vmem:[#allocation11 + $0x1f0] ss:$24 sps:$4 sm:$0xff]   ;;  %v4175_v33 = vld [vmem:[#allocation11 + $0x1c4] ss:$24 sps:$4 sm:$0xff]  }
 0x30f   :  { %3001 = vmatprep.mubr.bf16.mxu0 %v4513_v34 }
 0x310   :  { %3002 = vmatmul.mubr.bf16.vlgmr.msra.gmra.mxu0 %v4515_v36  ;;  %3043 = vmatmul.mubr.bf16.vlgmr.msra.gmra.mxu1 %v4504_v45 }
 0x311   :  { %3052 = vmatpush1.bf16.msra.mxu0 %v4086_v35  ;;  %3083 = vmatprep.mubr.bf16.mxu0 %v4513_v34  ;;  %v4170_v35 = vld [vmem:[#allocation11 + $0x4b8] ss:$24 sps:$4 sm:$0xff]  }
 0x312   :  { %3093 = vmatpush1.bf16.msra.mxu1 %v4089_v37  ;;  %3124 = vmatprep.mubr.bf16.mxu1 %v4502_v41  ;;  %v4115_v41 = vld [vmem:[#allocation11 + $0xa4] ss:$24 sps:$4 sm:$0xff]   ;;  %v4173_v37 = vld [vmem:[#allocation11 + $0x1c0] ss:$24 sps:$4 sm:$0xff]  }
 0x313   :  { %3053 = vmatprep.subr.bf16.mxu0 %v4094_v38  ;;  %3094 = vmatprep.subr.bf16.mxu1 %v4097_v39  ;;  %v4178_v38 = vld [vmem:[#allocation11 + $0x48c] ss:$24 sps:$4 sm:$0xff]  }
 0x314   :  { %v4181_v39 = vld [vmem:[#allocation11 + $0x194] ss:$24 sps:$4 sm:$0xff]  }
 0x315   :  { %3054 = vmatpush1.bf16.msra.mxu0 %v4092_v40  ;;  %v4176_v40 = vld [vmem:[#allocation11 + $0x488] ss:$24 sps:$4 sm:$0xff]  }
 0x316   :  { %3095 = vmatpush1.bf16.msra.mxu1 %v4095_v43  ;;  %3055 = vmatprep.subr.bf16.mxu0 %v4100_v46  ;;  %v4179_v43 = vld [vmem:[#allocation11 + $0x190] ss:$24 sps:$4 sm:$0xff]   ;;  %v4184_v46 = vld [vmem:[#allocation11 + $0x464] ss:$24 sps:$4 sm:$0xff]  }
 0x317   :  { %3096 = vmatprep.subr.bf16.mxu1 %v4103_v47  ;;  %v4182_v47 = vld [vmem:[#allocation11 + $0x460] ss:$24 sps:$4 sm:$0xff]  }
 0x319   :  { %3056 = vmatpush1.bf16.msra.mxu0 %v4098_v48  ;;  %v4187_v48 = vld [vmem:[#allocation11 + $0x434] ss:$24 sps:$4 sm:$0xff]  }
 0x31a   :  { %3097 = vmatpush1.bf16.msra.mxu1 %v4101_v49  ;;  %3057 = vmatprep.subr.bf16.mxu0 %v4106_v50  ;;  %v4185_v49 = vld [vmem:[#allocation11 + $0x430] ss:$24 sps:$4 sm:$0xff]   ;;  %v4190_v50 = vld [vmem:[#allocation11 + $0x404] ss:$24 sps:$4 sm:$0xff]  }
 0x31b   :  { %3098 = vmatprep.subr.bf16.mxu1 %v4109_v51  ;;  %v4188_v51 = vld [vmem:[#allocation11 + $0x400] ss:$24 sps:$4 sm:$0xff]  }
 0x31d   :  { %3058 = vmatpush1.bf16.msra.mxu0 %v4104_v52  ;;  %v4193_v52 = vld [vmem:[#allocation11 + $0x3d4] ss:$24 sps:$4 sm:$0xff]  }
 0x31e   :  { %3099 = vmatpush1.bf16.msra.mxu1 %v4107_v53  ;;  %3059 = vmatprep.subr.bf16.mxu0 %v4112_v54  ;;  %v4191_v53 = vld [vmem:[#allocation11 + $0x3d0] ss:$24 sps:$4 sm:$0xff]   ;;  %v4196_v54 = vld [vmem:[#allocation11 + $0x3a4] ss:$24 sps:$4 sm:$0xff]  }
 0x31f   :  { %3100 = vmatprep.subr.bf16.mxu1 %v4115_v41  ;;  %v4194_v41 = vld [vmem:[#allocation11 + $0x3a0] ss:$24 sps:$4 sm:$0xff]  }
 0x321   :  { %3060 = vmatpush1.bf16.msra.mxu0 %v4110_v55  ;;  %v4199_v55 = vld [vmem:[#allocation11 + $0x374] ss:$24 sps:$4 sm:$0xff]  }
 0x322   :  { %3101 = vmatpush1.bf16.msra.mxu1 %v4113_v56  ;;  %3061 = vmatprep.subr.bf16.mxu0 %v4118_v57  ;;  %v4202_v56 = vld [vmem:[#allocation11 + $0x344] ss:$24 sps:$4 sm:$0xff]   ;;  %v4205_v57 = vld [vmem:[#allocation11 + $0x314] ss:$24 sps:$4 sm:$0xff]  }
 0x323   :  { %3102 = vmatprep.subr.bf16.mxu1 %v4121_v58  ;;  %v4203_v58 = vld [vmem:[#allocation11 + $0x310] ss:$24 sps:$4 sm:$0xff]  }
 0x325   :  { %3062 = vmatpush1.bf16.msra.mxu0 %v4116_v59  ;;  %v4208_v59 = vld [vmem:[#allocation11 + $0x5e4] ss:$24 sps:$4 sm:$0xff]  }
 0x326   :  { %3103 = vmatpush1.bf16.msra.mxu1 %v4119_v60  ;;  %3063 = vmatprep.subr.bf16.mxu0 %v4124_v61  ;;  %v4206_v60 = vld [vmem:[#allocation11 + $0x5e0] ss:$24 sps:$4 sm:$0xff]   ;;  %v4211_v61 = vld [vmem:[#allocation11 + $0x5b4] ss:$24 sps:$4 sm:$0xff]  }
 0x327   :  { %3104 = vmatprep.subr.bf16.mxu1 %v4127_v62  ;;  %v4209_v62 = vld [vmem:[#allocation11 + $0x5b0] ss:$24 sps:$4 sm:$0xff]  }
 0x329   :  { %3064 = vmatpush1.bf16.msra.mxu0 %v4122_v63  ;;  %v4214_v63 = vld [vmem:[#allocation11 + $0x584] ss:$24 sps:$4 sm:$0xff]  }
 0x32a   :  { %3105 = vmatpush1.bf16.msra.mxu1 %v4125_v0  ;;  %3065 = vmatprep.subr.bf16.mxu0 %v4130_v1  ;;  %v4212_v0 = vld [vmem:[#allocation11 + $0x580] ss:$24 sps:$4 sm:$0xff]   ;;  %v4217_v1 = vld [vmem:[#allocation11 + $0x554] ss:$24 sps:$4 sm:$0xff]  }
 0x32b   :  { %3106 = vmatprep.subr.bf16.mxu1 %v4133_v2  ;;  %v4215_v2 = vld [vmem:[#allocation11 + $0x550] ss:$24 sps:$4 sm:$0xff]  }
 0x32d   :  { %3066 = vmatpush1.bf16.msra.mxu0 %v4128_v3  ;;  %v4220_v3 = vld [vmem:[#allocation11 + $0x524] ss:$24 sps:$4 sm:$0xff]  }
 0x32e   :  { %3107 = vmatpush1.bf16.msra.mxu1 %v4131_v4  ;;  %3067 = vmatprep.subr.bf16.mxu0 %v4136_v5  ;;  %v4218_v4 = vld [vmem:[#allocation11 + $0x520] ss:$24 sps:$4 sm:$0xff]   ;;  %v4223_v5 = vld [vmem:[#allocation11 + $0x4f4] ss:$24 sps:$4 sm:$0xff]  }
 0x32f   :  { %3108 = vmatprep.subr.bf16.mxu1 %v4139_v6  ;;  %v4221_v6 = vld [vmem:[#allocation11 + $0x4f0] ss:$24 sps:$4 sm:$0xff]  }
 0x331   :  { %3068 = vmatpush2.bf16.msra.mxu0 %v4134_v8  ;;  %v4226_v8 = vld [vmem:[#allocation11 + $0x4c4] ss:$24 sps:$4 sm:$0xff]  }
 0x332   :  { %3109 = vmatpush2.bf16.msra.mxu1 %v4137_v9  ;;  %3069 = vmatprep.subr.bf16.mxu0 %v4142_v11  ;;  %v4224_v9 = vld [vmem:[#allocation11 + $0x4c0] ss:$24 sps:$4 sm:$0xff]   ;;  %v4229_v11 = vld [vmem:[#allocation11 + $0x494] ss:$24 sps:$4 sm:$0xff]  }
 0x333   :  { %3110 = vmatprep.subr.bf16.mxu1 %v4145_v12  ;;  %v4227_v12 = vld [vmem:[#allocation11 + $0x490] ss:$24 sps:$4 sm:$0xff]  }
 0x335   :  { %3070 = vmatpush2.bf16.msra.mxu0 %v4140_v13 }
 0x336   :  { %3111 = vmatpush2.bf16.msra.mxu1 %v4143_v14  ;;  %3071 = vmatprep.subr.bf16.mxu0 %v4148_v15 }
 0x337   :  { %3112 = vmatprep.subr.bf16.mxu1 %v4151_v16 }
 0x339   :  { %3072 = vmatpush2.bf16.msra.mxu0 %v4146_v17  ;;  %v1936_v17 = vld [vmem:[%s4546_s8] sm:$0x3f]  ;;  %s4393_s8 = smov [#allocation13]  }
 0x33a   :  { %3113 = vmatpush2.bf16.msra.mxu1 %v4149_v18  ;;  %3073 = vmatprep.subr.bf16.mxu0 %v4154_v19  ;;  %v1941_v18 = vrot.slane %v1936_v17, %v4465_v22  ;;  %v1945_v19 = vrot.slane %v1936_v17, %v4471_v24  ;;  %v1949_v24 = vrot.slane %v1936_v17, %v4476_v42  ;;  %s3204_s22 = sshll.u32 %s4393_s8, 4  ;;  %s3205_s22 = int_to_ptr.vmem [resolvable:$true] %s3204_s22 }
 0x33b   :  { %3114 = vmatprep.subr.bf16.mxu1 %v4157_v20  ;;  %s4350_s23 = scalar_lea.vmem %s3205_s22, 768  ;;  %p4355_p3 = scmp.lt.s32.totalorder %s3205_s22, %s3205_s22 }
 0x33c   :  { %p4351_p2 = scmp.ne.s32.totalorder %s3205_s22, %s4350_s23  ;;  %p4356_p4 = scmp.lt.s32.totalorder %s4350_s23, %s4350_s23 }
 0x33d   :  { %3074 = vmatpush2.bf16.msra.mxu0 %v4152_v25 }
 0x33e   :  { %3115 = vmatpush2.bf16.msra.mxu1 %v4155_v26  ;;  %3075 = vmatprep.subr.bf16.mxu0 %v4160_v27  ;;  %p4357_p5 = por %p4356_p4, %p4355_p3 }
 0x33f   :  { %3116 = vmatprep.subr.bf16.mxu1 %v4163_v7 }
 0x340   :  { %p4358_p6 = pnand %p4357_p5, %p4351_p2 }
 0x341   :  { %3076 = vmatpush2.bf16.msra.mxu0 %v4158_v10 }
 0x342   :  { %3117 = vmatpush2.bf16.msra.mxu1 %v4161_v28  ;;  %3077 = vmatprep.subr.bf16.mxu0 %v4166_v23 }
 0x343   :  { %3118 = vmatprep.subr.bf16.mxu1 %v4169_v29 }
 0x345   :  { %3078 = vmatpush2.bf16.msra.mxu0 %v4164_v30 }
 0x346   :  { %3119 = vmatpush2.bf16.msra.mxu1 %v4167_v31  ;;  %3079 = vmatprep.subr.bf16.mxu0 %v4172_v32 }
 0x347   :  { %3120 = vmatprep.subr.bf16.mxu1 %v4175_v33 }
 0x349   :  { %3080 = vmatpush2.bf16.msra.mxu0 %v4170_v35 }
 0x34a   :  { %3121 = vmatpush2.bf16.msra.mxu1 %v4173_v37  ;;  %3081 = vmatprep.subr.bf16.mxu0 %v4178_v38  ;;  %v1953_v37 = vrot.slane %v1936_v17, %v4482_v44  ;;  %v1956_v44 = vsub.s32 4, %v4462_v21 }
 0x34b   :  { %3122 = vmatprep.subr.bf16.mxu1 %v4181_v39 }
 0x34d   :  { %3082 = vmatpush2.bf16.msra.mxu0 %v4176_v40 }
 0x34e   :  { %3123 = vmatpush2.bf16.msra.mxu1 %v4179_v43  ;;  %3133 = vmatprep.subr.bf16.mxu0 %v4184_v46 }
 0x350   :  { %3084 = vmatmul.mubr.bf16.vlgmr.msra.gmra.mxu0 %v4515_v36 }
 0x351   :  { %3125 = vmatmul.mubr.bf16.vlgmr.msra.gmra.mxu1 %v4504_v45  ;;  %3134 = vmatpush1.bf16.msra.mxu0 %v4182_v47  ;;  %v4197_v45 = vld [vmem:[#allocation11 + $0x370] ss:$24 sps:$4 sm:$0xff]  }
 0x352   :  { %3165 = vmatprep.mubr.bf16.mxu0 %v4513_v34  ;;  %3135 = vmatprep.subr.bf16.mxu0 %v4187_v48  ;;  %v4200_v34 = vld [vmem:[#allocation11 + $0x340] ss:$24 sps:$4 sm:$0xff]  }
 0x355   :  { %3136 = vmatpush1.bf16.msra.mxu0 %v4185_v49 }
 0x356   :  { %3137 = vmatprep.subr.bf16.mxu0 %v4190_v50 }
 0x359   :  { %3138 = vmatpush1.bf16.msra.mxu0 %v4188_v51 }
 0x35a   :  { %3139 = vmatprep.subr.bf16.mxu0 %v4193_v52 }
 0x35d   :  { %3140 = vmatpush1.bf16.msra.mxu0 %v4191_v53 }
 0x35e   :  { %3141 = vmatprep.subr.bf16.mxu0 %v4196_v54 }
 0x361   :  { %3142 = vmatpush1.bf16.msra.mxu0 %v4194_v41 }
 0x362   :  { %3143 = vmatprep.subr.bf16.mxu0 %v4199_v55 }
 0x365   :  { %3144 = vmatpush1.bf16.msra.mxu0 %v4197_v45  ;;  %v1960_v45 = vsub.s32 5, %v4462_v21 }
 0x366   :  { %3145 = vmatprep.subr.bf16.mxu0 %v4202_v56  ;;  %v1957_v56 = vrot.slane %v1936_v17, %v1956_v44 }
 0x369   :  { %3146 = vmatpush1.bf16.msra.mxu0 %v4200_v34  ;;  %v1961_v34 = vrot.slane %v1936_v17, %v1960_v45 }
 0x36a   :  { %3147 = vmatprep.subr.bf16.mxu0 %v4205_v57 }
 0x36d   :  { %3148 = vmatpush1.bf16.msra.mxu0 %v4203_v58 }
 0x36e   :  { %3149 = vmatprep.subr.bf16.mxu0 %v4208_v59 }
 0x371   :  { %3150 = vmatpush2.bf16.msra.mxu0 %v4206_v60 }
 0x372   :  { %3151 = vmatprep.subr.bf16.mxu0 %v4211_v61 }
 0x375   :  { %3152 = vmatpush2.bf16.msra.mxu0 %v4209_v62 }
 0x376   :  { %3153 = vmatprep.subr.bf16.mxu0 %v4214_v63 }
 0x379   :  { %3154 = vmatpush2.bf16.msra.mxu0 %v4212_v0 }
 0x37a   :  { %3155 = vmatprep.subr.bf16.mxu0 %v4217_v1 }
 0x37d   :  { %3156 = vmatpush2.bf16.msra.mxu0 %v4215_v2 }
 0x37e   :  { %3157 = vmatprep.subr.bf16.mxu0 %v4220_v3 }
 0x381   :  { %3158 = vmatpush2.bf16.msra.mxu0 %v4218_v4 }
 0x382   :  { %3159 = vmatprep.subr.bf16.mxu0 %v4223_v5 }
 0x385   :  { %3160 = vmatpush2.bf16.msra.mxu0 %v4221_v6 }
 0x386   :  { %3161 = vmatprep.subr.bf16.mxu0 %v4226_v8 }
 0x389   :  { %3162 = vmatpush2.bf16.msra.mxu0 %v4224_v9 }
 0x38a   :  { %3163 = vmatprep.subr.bf16.mxu0 %v4229_v11 }
 0x38d   :  { %3164 = vmatpush2.bf16.msra.mxu0 %v4227_v12 }
 0x390   :  { %3166 = vmatmul.mubr.bf16.vlgmr.msra.gmra.mxu0 %v4515_v36  ;;  %v2962_v13 = vpop.f32.mrf.mxu1 }
 0x391   :  { %v2963_v20 = vadd.f32 %v2962_v13, %v1941_v18 }
 0x392   :  { %v2964_v14 = vpop.f32.mrf.mxu1 }
 0x393   :  { %v2965_v27 = vadd.f32 %v2964_v14, %v1945_v19 }
 0x394   :  { %v2966_v15 = vpop.f32.mrf.mxu1 }
 0x396   :  { %v2967_v16 = vpop.f32.mrf.mxu1 }
 0x3d0   :  { %v3003_v25 = vpop.f32.mrf.mxu0  ;;  %v3044_v26 = vpop.f32.mrf.mxu1 }
 0x3d1   :  { %v3004_v7 = vadd.f32 %v3003_v25, %v2963_v20  ;;  %v3045_v38 = vadd.f32 %v3044_v26, %v1949_v24 }
 0x3d2   :  { %v3005_v10 = vpop.f32.mrf.mxu0  ;;  %v3046_v28 = vpop.f32.mrf.mxu1 }
 0x3d3   :  { %vm3174_vm10 = vcmp.gt.f32.partialorder %v3004_v7, 0.0  ;;  %v3180_v36 = vmul.f32 0.01, %v3004_v7  ;;  %v3006_v23 = vadd.f32 %v3005_v10, %v2965_v27  ;;  %v3047_v40 = vadd.f32 %v3046_v28, %v1953_v37 }
 0x3d4   :  { %v3007_v29 = vpop.f32.mrf.mxu0  ;;  %v3048_v30 = vpop.f32.mrf.mxu1 }
 0x3d5   :  { %v3186_v31 = vsel %vm3174_vm10, %v3004_v7, %v3180_v36  ;;  %vm3175_vm11 = vcmp.gt.f32.partialorder %v3006_v23, 0.0  ;;  %v3181_v32 = vmul.f32 0.01, %v3006_v23 }
 0x3d6   :  { %3192 = vst [vmem:[#allocation13] sm:$0xff] %v3186_v31  ;;  %v3008_v33 = vpop.f32.mrf.mxu0  ;;  %v3049_v22 = vpop.f32.mrf.mxu1 }
 0x3d7   :  { %v3187_v35 = vsel %vm3175_vm11, %v3006_v23, %v3181_v32 }
 0x3d8   :  { %3193 = vst [vmem:[#allocation13 + $0x8] sm:$0xff] %v3187_v35 }
 0x410   :  { %v3085_v39 = vpop.f32.mrf.mxu0 }
 0x411   :  { %v3086_v43 = vadd.f32 %v3085_v39, %v3045_v38  ;;  %v3126_v46 = vpop.f32.mrf.mxu1 }
 0x412   :  { %v3087_v47 = vpop.f32.mrf.mxu0  ;;  %v3127_v57 = vadd.f32 %v3126_v46, %v1957_v56 }
 0x413   :  { %vm3176_vm12 = vcmp.gt.f32.partialorder %v3086_v43, 0.0  ;;  %v3182_v48 = vmul.f32 0.01, %v3086_v43  ;;  %v3088_v49 = vadd.f32 %v3087_v47, %v3047_v40  ;;  %v3128_v50 = vpop.f32.mrf.mxu1 }
 0x414   :  { %v3089_v51 = vpop.f32.mrf.mxu0  ;;  %v3129_v59 = vadd.f32 %v3128_v50, %v1961_v34 }
 0x415   :  { %v3188_v52 = vsel %vm3176_vm12, %v3086_v43, %v3182_v48  ;;  %vm3177_vm13 = vcmp.gt.f32.partialorder %v3088_v49, 0.0  ;;  %v3183_v53 = vmul.f32 0.01, %v3088_v49  ;;  %v3130_v54 = vpop.f32.mrf.mxu1 }
 0x416   :  { %3194 = vst [vmem:[#allocation13 + $0x10] sm:$0xff] %v3188_v52  ;;  %v3090_v41 = vpop.f32.mrf.mxu0 }
 0x417   :  { %v3189_v42 = vsel %vm3177_vm13, %v3088_v49, %v3183_v53  ;;  %v3131_v55 = vpop.f32.mrf.mxu1 }
 0x418   :  { %3195 = vst [vmem:[#allocation13 + $0x18] sm:$0xff] %v3189_v42 }
 0x450   :  { %v3167_v58 = vpop.f32.mrf.mxu0 }
 0x451   :  { %v3168_v60 = vadd.f32 %v3167_v58, %v3127_v57 }
 0x452   :  { %v3169_v61 = vpop.f32.mrf.mxu0 }
 0x453   :  { %vm3178_vm14 = vcmp.gt.f32.partialorder %v3168_v60, 0.0  ;;  %v3184_v62 = vmul.f32 0.01, %v3168_v60  ;;  %v3170_v63 = vadd.f32 %v3169_v61, %v3129_v59 }
 0x454   :  { %v3171_v0 = vpop.f32.mrf.mxu0 }
 0x455   :  { %v3190_v1 = vsel %vm3178_vm14, %v3168_v60, %v3184_v62  ;;  %vm3179_vm15 = vcmp.gt.f32.partialorder %v3170_v63, 0.0  ;;  %v3185_v2 = vmul.f32 0.01, %v3170_v63 }
 0x456   :  { %3196 = vst [vmem:[#allocation13 + $0x20] sm:$0xff] %v3190_v1  ;;  %v3172_v3 = vpop.f32.mrf.mxu0 }
 0x457   :  { %v3191_v21 = vsel %vm3179_vm15, %v3170_v63, %v3185_v2 }
 0x458   :  { %3197 = vst [vmem:[#allocation13 + $0x28] sm:$0xff] %v3191_v21 }
 0x459   :  { %4361 = shalt.err (!%p4358_p6)
}
 0x45a   :  { %3207 = dma.vmem_to_hbm [thread:$0]  %s3205_s22, 768, %s4547_s9, [#allocation4]  }
 0x45b   :  { %4378 = dma.done.wait [#allocation4], 768  }
 0x45c   :  { %4379 = vsyncadd [#allocation4], 4294966528 }
 0x45d   :  { %3211 = vsyncpa [#allocation3], 1 }
 0x45e   :  { %3212 = vsyncpa [#allocation6], 1 }
 0x45f   :  { %3213 = vsyncpa [#allocation9], 1 }
 0x460   :  { %3214 = vsyncpa [#allocation12], 1 }
 0x461   :  { %3215 = vsyncpa [#allocation4], 1 }

</bundles_post_ra>
